<compile_context>
chip_gen: v7x
topology: tpu7x:2x2x1
jax: 0.10.0
libtpu: 0.0.40
codegen_flags: <defaults>
</compile_context>

<pallas_src>
import numpy as np
import jax
import jax.numpy as jnp
from jax.experimental import pallas as pl
from jax.experimental.pallas import tpu as pltpu


# ---------------------------------------------------------------------------
# Host-side glue: 1D discretisation (mirrors gnp's Discretisation1d).
# multiple=128 keeps N_grid lane-aligned for the TPU.
# ---------------------------------------------------------------------------
class Discretisation1d:
    def __init__(self, points_per_unit, multiple=128, margin=0.1):
        self.points_per_unit = points_per_unit
        self.resolution = 1.0 / points_per_unit
        self.multiple = multiple
        self.margin = margin

    def __call__(self, *args):
        grid_min = min(float(np.min(np.asarray(a))) for a in args) - self.margin
        grid_max = max(float(np.max(np.asarray(a))) for a in args) + self.margin
        n_raw = (grid_max - grid_min) / self.resolution + 1
        n = int(np.ceil(n_raw / self.multiple) * self.multiple)
        pad = (n - 1) * self.resolution - (grid_max - grid_min)
        return jnp.linspace(grid_min - pad / 2.0, grid_max + pad / 2.0, n,
                            dtype=jnp.float32)


# ---------------------------------------------------------------------------
# Pallas kernel: one grid step = one (batch, row-tile, col-tile) block.
# Pure MXU + VPU + stores (RBF weights are precomputed outside).
# ---------------------------------------------------------------------------
def _setconv2d_kernel(wt_ref, w_ref, z_ref, out_ref):
    # wt_ref : VMEM (1, TI, n)     RBF weights for the row tile (transposed)
    # w_ref  : VMEM (1, n, TJ)     RBF weights for the column tile
    # z_ref  : VMEM (1, dim_y, n)  data values, one row per channel
    # out_ref: VMEM (1, 2+dim_y, TI, TJ)
    ti = out_ref.shape[2]
    tj = out_ref.shape[3]
    dim_y = z_ref.shape[1]

    wt = wt_ref[0]                                       # (TI, n)
    wj = w_ref[0]                                        # (n, TJ)

    # Channel 0: identity (1 on the global diagonal, 0 elsewhere). Cheap VPU
    # compare hidden under the output writebacks; removes any host-side eye.
    i0 = pl.program_id(1) * ti
    j0 = pl.program_id(2) * tj
    rows = jax.lax.broadcasted_iota(jnp.int32, (ti, tj), 0) + i0
    cols = jax.lax.broadcasted_iota(jnp.int32, (ti, tj), 1) + j0
    out_ref[0, 0, :, :] = (rows == cols).astype(out_ref.dtype)

    # Channel 1: unnormalised density = W_i^T @ W_j.
    density = jnp.dot(wt, wj, preferred_element_type=jnp.float32)   # (TI, TJ)
    out_ref[0, 1, :, :] = density.astype(out_ref.dtype)

    # Exact reciprocal (the approx EUP one was not accurate enough), computed
    # once per tile and reused by every data channel.
    inv = 1.0 / (density + 1e-8)

    # Data channels: fold z into the LHS (sublane broadcast of a (1, n) row);
    # all dots reuse the same RHS tile wj.
    for c in range(dim_y):
        lhs_c = wt * z_ref[0, c:c + 1, :]                            # (TI, n)
        num = jnp.dot(lhs_c, wj, preferred_element_type=jnp.float32)
        out_ref[0, 2 + c, :, :] = (num * inv).astype(out_ref.dtype)


def set_conv2d_encode(xz, z, x_grid, log_scale):
    """Pallas implementation of SetConv2dEncoder.forward (n > 0 branch)."""
    # TODO(synk): empty-context branch (B.shape(xz)[1] == 0) not implemented;
    #             callers must guarantee n > 0 and static shapes.
    bsz, n, _ = xz.shape
    dim_y = z.shape[-1]
    num_c = 2 + dim_y                       # identity + density + data
    n_grid = x_grid.shape[0]

    # Precompute the RBF weights once in XLA: O(B*n*N) exps total instead of
    # recomputing per output tile; the kernel becomes pure MXU + stores.
    coef = -0.5 * jnp.exp(-2.0 * log_scale)
    d = xz.astype(jnp.float32) - x_grid[None, None, :]               # (B, n, N)
    w = jnp.exp(coef * d * d).astype(jnp.float32)                    # (B, n, N)
    z_rows = jnp.transpose(z, (0, 2, 1)).astype(jnp.float32)         # (B, dy, n)

    # Pad the context dim to the f32 sublane multiple with EXACT zeros —
    # padded points contribute nothing to any dot (no far-away sentinel).
    n_pad = (-n) % 8
    if n_pad:
        w = jnp.pad(w, ((0, 0), (0, n_pad), (0, 0)))
        z_rows = jnp.pad(z_rows, ((0, 0), (0, 0), (0, n_pad)))
        n += n_pad
    w_t = jnp.transpose(w, (0, 2, 1))                                # (B, N, n)

    # Tile selection: lane-dense, contiguous row writes (TJ as wide as fits a
    # conservative VMEM budget sized for v7x's 64 MiB/TC). TI = 256 or 128;
    # keep at least 2 parallel grid units so both v7x TensorCores get work.
    ti = 256 if n_grid % 256 == 0 else 128
    if bsz * (n_grid // ti) < 2 and n_grid > 128:
        ti = 128

    def vmem_need(tj):
        out_blk = 2 * num_c * ti * tj * 4            # double-buffered out block
        in_blk = 2 * (ti * n + n * tj + dim_y * n) * 4
        live = (num_c + 4) * ti * tj * 4             # in-kernel temporaries
        return out_blk + in_blk + live

    budget = 28 * 1024 * 1024
    tj = next((t for t in range(n_grid, 127, -128)
               if n_grid % t == 0 and vmem_need(t) <= budget), 128)
    vmem_limit = int(min(max(vmem_need(tj) + 8 * 1024 * 1024,
                             24 * 1024 * 1024), 56 * 1024 * 1024))

    out = pl.pallas_call(
        _setconv2d_kernel,
        out_shape=jax.ShapeDtypeStruct((bsz, num_c, n_grid, n_grid), z.dtype),
        grid_spec=pltpu.PrefetchScalarGridSpec(
            num_scalar_prefetch=0,
            grid=(bsz, n_grid // ti, n_grid // tj),
            in_specs=[
                pl.BlockSpec((1, ti, n), lambda b, i, j: (b, i, 0)),      # W^T
                pl.BlockSpec((1, n, tj), lambda b, i, j: (b, 0, j)),      # W
                pl.BlockSpec((1, dim_y, n), lambda b, i, j: (b, 0, 0)),   # z
            ],
            out_specs=pl.BlockSpec((1, num_c, ti, tj),
                                   lambda b, i, j: (b, 0, i, j)),
        ),
        compiler_params=pltpu.CompilerParams(
            dimension_semantics=("parallel", "parallel", "parallel"),
            vmem_limit_bytes=vmem_limit),
    )(w_t, w, z_rows)

    return x_grid, out


# ---------------------------------------------------------------------------
# Pure-JAX reference (direct transcription of the PyTorch/B.* forward).
# ---------------------------------------------------------------------------
def reference(xz, z, x_grid, log_scale):
    bsz = xz.shape[0]
    n_grid = x_grid.shape[0]
    identity = jnp.broadcast_to(jnp.eye(n_grid, dtype=z.dtype),
                                (bsz, 1, n_grid, n_grid))
    density = jnp.ones(z.shape[:2] + (1,), z.dtype)
    zc = jnp.concatenate([density, z], axis=2)                   # (B, n, C)
    zt = jnp.transpose(zc, (0, 2, 1))[..., None]                 # (B, C, n, 1)
    d2 = (xz - x_grid[None, None, :]) ** 2                       # (B, n, N)
    w = jnp.exp(-0.5 * d2 / jnp.exp(2.0 * log_scale))
    w4 = w[:, None, :, :]                                        # (B, 1, n, N)
    out = jnp.matmul(jnp.swapaxes(w4 * zt, -1, -2), w4,
                     precision=jax.lax.Precision.HIGHEST)        # (B, C, N, N)
    out = jnp.concatenate([out[:, :1], out[:, 1:] / (out[:, :1] + 1e-8)],
                          axis=1)
    return x_grid, jnp.concatenate([identity, out], axis=1)


if __name__ == "__main__":
    key = jax.random.PRNGKey(0)
    kx, kz, kt = jax.random.split(key, 3)

    batch, n_ctx, dim_y, n_tgt = 2, 8, 2, 16
    points_per_unit = 16

    xz = jax.random.uniform(kx, (batch, n_ctx, 1), jnp.float32, -8.0, 8.0)
    z = jax.random.normal(kz, (batch, n_ctx, dim_y), jnp.float32)
    x = jax.random.uniform(kt, (batch, n_tgt, 1), jnp.float32, -8.0, 8.0)

    # Deterministic parameter init: log_scale = log(2 / points_per_unit).
    log_scale = jnp.asarray(np.log(2.0 / points_per_unit), jnp.float32)

    disc = Discretisation1d(points_per_unit=points_per_unit,
                            multiple=128, margin=0.1)
    x_grid = disc(xz, x)                    # (N_grid,), multiple of 128

    xg_out, z_out = set_conv2d_encode(xz, z, x_grid, log_scale)
    jax.block_until_ready(z_out)

    xg_ref, z_ref = reference(xz, z, x_grid, log_scale)
    np.testing.assert_allclose(np.asarray(z_out), np.asarray(z_ref),
                               rtol=2e-3, atol=2e-3)

    print("KERNEL_OK")
</pallas_src>

<mosaic_0001>
module attributes {stable_mosaic.version = 11 : i64} {
  func.func @_setconv2d_kernel(%arg0: i32, %arg1: i32, %arg2: i32, %arg3: memref<1x256x8xf32, #tpu.memory_space<vmem>>, %arg4: memref<1x8x256xf32, #tpu.memory_space<vmem>>, %arg5: memref<1x2x8xf32, #tpu.memory_space<vmem>>, %arg6: memref<1x4x256x256xf32, #tpu.memory_space<vmem>>) attributes {dimension_semantics = [#tpu.dimension_semantics<parallel>, #tpu.dimension_semantics<parallel>, #tpu.dimension_semantics<parallel>], iteration_bounds = array<i64: 2, 1, 1>, scalar_prefetch = 0 : i64, scratch_operands = 0 : i64, tpu.core_type = #tpu.core_type<tc>, window_params = [{transform_indices = @transform_0, window_bounds = array<i64: 1, 256, 8>}, {transform_indices = @transform_1, window_bounds = array<i64: 1, 8, 256>}, {transform_indices = @transform_2, window_bounds = array<i64: 1, 2, 8>}, {transform_indices = @transform_3, window_bounds = array<i64: 1, 4, 256, 256>}]} {
    %c0 = arith.constant 0 : index
    %c0_0 = arith.constant 0 : index
    %c0_1 = arith.constant 0 : index
    %0 = vector.load %arg3[%c0, %c0_0, %c0_1] : memref<1x256x8xf32, #tpu.memory_space<vmem>>, vector<1x256x8xf32>
    %1 = vector.shape_cast %0 : vector<1x256x8xf32> to vector<256x8xf32>
    %c0_2 = arith.constant 0 : index
    %c0_3 = arith.constant 0 : index
    %c0_4 = arith.constant 0 : index
    %2 = vector.load %arg4[%c0_2, %c0_3, %c0_4] : memref<1x8x256xf32, #tpu.memory_space<vmem>>, vector<1x8x256xf32>
    %3 = vector.shape_cast %2 : vector<1x8x256xf32> to vector<8x256xf32>
    %c256_i32 = arith.constant 256 : i32
    %4 = arith.muli %arg1, %c256_i32 : i32
    %c256_i32_5 = arith.constant 256 : i32
    %5 = arith.muli %arg2, %c256_i32_5 : i32
    %6 = tpu.iota {dimensions = array<i32: 0>} : vector<256x256xi32>
    %7 = vector.broadcast %4 : i32 to vector<256x256xi32>
    %8 = arith.addi %6, %7 : vector<256x256xi32>
    %9 = tpu.iota {dimensions = array<i32: 1>} : vector<256x256xi32>
    %10 = vector.broadcast %5 : i32 to vector<256x256xi32>
    %11 = arith.addi %9, %10 : vector<256x256xi32>
    %12 = arith.cmpi eq, %8, %11 : vector<256x256xi32>
    %13 = arith.extui %12 : vector<256x256xi1> to vector<256x256xi32>
    %14 = arith.sitofp %13 : vector<256x256xi32> to vector<256x256xf32>
    %c0_6 = arith.constant 0 : index
    %c0_7 = arith.constant 0 : index
    %c0_8 = arith.constant 0 : index
    %c0_9 = arith.constant 0 : index
    %15 = vector.load %arg6[%c0_6, %c0_7, %c0_8, %c0_9] : memref<1x4x256x256xf32, #tpu.memory_space<vmem>>, vector<1x1x256x256xf32>
    %16 = vector.shape_cast %15 : vector<1x1x256x256xf32> to vector<256x256xf32>
    %17 = vector.shape_cast %14 : vector<256x256xf32> to vector<1x1x256x256xf32>
    tpu.vector_store %arg6[%c0_6, %c0_7, %c0_8, %c0_9], %17 {strides = array<i32>} : memref<1x4x256x256xf32, #tpu.memory_space<vmem>>, vector<1x1x256x256xf32>,
    %cst = arith.constant dense<0.000000e+00> : vector<256x256xf32>
    %18 = tpu.matmul %1, %3, %cst {dimension_numbers = #tpu.dot_dimension_numbers<[1], [0], [0], [1], [0, 0, 1, 1], [], []>} : vector<256x8xf32>, vector<8x256xf32>, vector<256x256xf32> -> vector<256x256xf32>
    %c0_10 = arith.constant 0 : index
    %c1 = arith.constant 1 : index
    %c0_11 = arith.constant 0 : index
    %c0_12 = arith.constant 0 : index
    %19 = vector.load %arg6[%c0_10, %c1, %c0_11, %c0_12] : memref<1x4x256x256xf32, #tpu.memory_space<vmem>>, vector<1x1x256x256xf32>
    %20 = vector.shape_cast %19 : vector<1x1x256x256xf32> to vector<256x256xf32>
    %21 = vector.shape_cast %18 : vector<256x256xf32> to vector<1x1x256x256xf32>
    tpu.vector_store %arg6[%c0_10, %c1, %c0_11, %c0_12], %21 {strides = array<i32>} : memref<1x4x256x256xf32, #tpu.memory_space<vmem>>, vector<1x1x256x256xf32>,
    %cst_13 = arith.constant 9.99999993E-9 : f32
    %22 = vector.broadcast %cst_13 : f32 to vector<256x256xf32>
    %23 = arith.addf %18, %22 : vector<256x256xf32>
    %cst_14 = arith.constant 1.000000e+00 : f32
    %24 = vector.broadcast %cst_14 : f32 to vector<256x256xf32>
    %25 = arith.divf %24, %23 : vector<256x256xf32>
    %c0_15 = arith.constant 0 : index
    %c0_16 = arith.constant 0 : index
    %c0_17 = arith.constant 0 : index
    %26 = vector.load %arg5[%c0_15, %c0_16, %c0_17] : memref<1x2x8xf32, #tpu.memory_space<vmem>>, vector<1x1x8xf32>
    %27 = vector.shape_cast %26 : vector<1x1x8xf32> to vector<1x8xf32>
    %28 = vector.broadcast %27 : vector<1x8xf32> to vector<256x8xf32>
    %29 = arith.mulf %1, %28 : vector<256x8xf32>
    %cst_18 = arith.constant dense<0.000000e+00> : vector<256x256xf32>
    %30 = tpu.matmul %29, %3, %cst_18 {dimension_numbers = #tpu.dot_dimension_numbers<[1], [0], [0], [1], [0, 0, 1, 1], [], []>} : vector<256x8xf32>, vector<8x256xf32>, vector<256x256xf32> -> vector<256x256xf32>
    %31 = arith.mulf %30, %25 : vector<256x256xf32>
    %c0_19 = arith.constant 0 : index
    %c2 = arith.constant 2 : index
    %c0_20 = arith.constant 0 : index
    %c0_21 = arith.constant 0 : index
    %32 = vector.load %arg6[%c0_19, %c2, %c0_20, %c0_21] : memref<1x4x256x256xf32, #tpu.memory_space<vmem>>, vector<1x1x256x256xf32>
    %33 = vector.shape_cast %32 : vector<1x1x256x256xf32> to vector<256x256xf32>
    %34 = vector.shape_cast %31 : vector<256x256xf32> to vector<1x1x256x256xf32>
    tpu.vector_store %arg6[%c0_19, %c2, %c0_20, %c0_21], %34 {strides = array<i32>} : memref<1x4x256x256xf32, #tpu.memory_space<vmem>>, vector<1x1x256x256xf32>,
    %c0_22 = arith.constant 0 : index
    %c1_23 = arith.constant 1 : index
    %c0_24 = arith.constant 0 : index
    %35 = vector.load %arg5[%c0_22, %c1_23, %c0_24] : memref<1x2x8xf32, #tpu.memory_space<vmem>>, vector<1x1x8xf32>
    %36 = vector.shape_cast %35 : vector<1x1x8xf32> to vector<1x8xf32>
    %37 = vector.broadcast %36 : vector<1x8xf32> to vector<256x8xf32>
    %38 = arith.mulf %1, %37 : vector<256x8xf32>
    %cst_25 = arith.constant dense<0.000000e+00> : vector<256x256xf32>
    %39 = tpu.matmul %38, %3, %cst_25 {dimension_numbers = #tpu.dot_dimension_numbers<[1], [0], [0], [1], [0, 0, 1, 1], [], []>} : vector<256x8xf32>, vector<8x256xf32>, vector<256x256xf32> -> vector<256x256xf32>
    %40 = arith.mulf %39, %25 : vector<256x256xf32>
    %c0_26 = arith.constant 0 : index
    %c3 = arith.constant 3 : index
    %c0_27 = arith.constant 0 : index
    %c0_28 = arith.constant 0 : index
    %41 = vector.load %arg6[%c0_26, %c3, %c0_27, %c0_28] : memref<1x4x256x256xf32, #tpu.memory_space<vmem>>, vector<1x1x256x256xf32>
    %42 = vector.shape_cast %41 : vector<1x1x256x256xf32> to vector<256x256xf32>
    %43 = vector.shape_cast %40 : vector<256x256xf32> to vector<1x1x256x256xf32>
    tpu.vector_store %arg6[%c0_26, %c3, %c0_27, %c0_28], %43 {strides = array<i32>} : memref<1x4x256x256xf32, #tpu.memory_space<vmem>>, vector<1x1x256x256xf32>,
    return
  }
  func.func @transform_0(%arg0: i32, %arg1: i32, %arg2: i32) -> (i32, i32, i32) {
    %c0_i32 = arith.constant 0 : i32
    %c0_i32_0 = arith.constant 0 : i32
    return %arg0, %arg1, %c0_i32 : i32, i32, i32
  }
  func.func @transform_1(%arg0: i32, %arg1: i32, %arg2: i32) -> (i32, i32, i32) {
    %c0_i32 = arith.constant 0 : i32
    %c0_i32_0 = arith.constant 0 : i32
    return %arg0, %c0_i32, %arg2 : i32, i32, i32
  }
  func.func @transform_2(%arg0: i32, %arg1: i32, %arg2: i32) -> (i32, i32, i32) {
    %c0_i32 = arith.constant 0 : i32
    %c0_i32_0 = arith.constant 0 : i32
    %c0_i32_1 = arith.constant 0 : i32
    return %arg0, %c0_i32, %c0_i32_0 : i32, i32, i32
  }
  func.func @transform_3(%arg0: i32, %arg1: i32, %arg2: i32) -> (i32, i32, i32, i32) {
    %c0_i32 = arith.constant 0 : i32
    %c0_i32_0 = arith.constant 0 : i32
    return %arg0, %c0_i32, %arg1, %arg2 : i32, i32, i32, i32
  }
}

</mosaic_0001>

<bundles_post_ra>
// kernel: tpu_custom_call.1
= control target key start
LH: loop header
LB: loop body
LE: loop exit
PB: predicated region body
PF: predicated region fallthrough
CT: control target
= control target key end

     0   :  { %8 = vsyncpa [#allocation3], 0  ;;  %s4745_s0 = inlined_call_operand.vmem [shape: f32[2,256,8], index: 0, kind: input, shape index: {}]   ;;  %s4746_s1 = inlined_call_operand.hbm [shape: f32[2,8,256], index: 1, kind: input, shape index: {}]   ;;  %s4747_s2 = inlined_call_operand.hbm [shape: f32[2,2,8], index: 2, kind: input, shape index: {}]   ;;  %s4748_s3 = inlined_call_operand.hbm [shape: f32[2,4,256,256], index: 3, kind: output, shape index: {}]  }
   0x1   :  { %10 = vsyncpa [#allocation3 + $0x1], 0 }
   0x2   :  { %11 = vsyncpa [#allocation6], 0 }
   0x3   :  { %13 = vsyncpa [#allocation6 + $0x1], 0 }
   0x4   :  { %14 = vsyncpa [#allocation4], 0 }
   0x5   :  { %16 = vsyncpa [#allocation4 + $0x1], 0  ;;  %s3203_s12 = smov 0   ;;  %s3205_s13 = smov 0  }
   0x6   :  { %s3207_s14 = smov 0   ;;  %s3209_s15 = smov 0  }
   0x7   :  { %s3211_s16 = smov 0   ;;  %s3213_s17 = smov 0  }
   0x8 LB: > { %s2455_s18 = sadd.s32 4294967295, %s3175_s17   ;;  %s2456_s19 = sadd.s32 4294967294, %s3175_s17   ;;  %s3175_s17 = sphi %s3213_s17, %s22_s17   ;;  %s3171_s16 = sphi %s3211_s16, %s4814_s16   ;;  %s3167_s15 = sphi %s3209_s15, %s4813_s15   ;;  %s3163_s14 = sphi %s3207_s14, %s4812_s14   ;;  %s3159_s13 = sphi %s3205_s13, %s4811_s13   ;;  %s3155_s12 = sphi %s3203_s12, %s4810_s12  }
   0x9   : > { %s41_s20 = sadd.s32 1, %s3171_s16  ;;  %s78_s21 = sadd.s32 1, %s3163_s14 }
   0xa   : > { %p43_p0 = scmp.ge.s32.totalorder %s41_s20, 2  ;;  %p85_p1 = scmp.ne.s32.totalorder %s3163_s14, %s3159_s13 }
   0xb   : > { %p86_p2 = scmp.eq.s32.totalorder %s3175_s17, 0  ;;  %p91_p3 = scmp.ne.s32.totalorder %s3159_s13, %s3155_s12 }
   0xc   : > { %s4816_s20 = smov (%p43_p0, %s41_s20), 0  ;;  %p92_p5 = scmp.eq.s32.totalorder %s2455_s18, 0 }
   0xd   : > { %p3244_p4 = por %p86_p2, %p85_p1  ;;  %s73_s23 = ssub.s32 %s3171_s16, %s4816_s20 }
   0xe   : > { %p145_p6 = scmp.eq.s32.totalorder %s2455_s18, 1  ;;  %p76_p7 = scmp.eq.s32.totalorder %s73_s23, 0 }
   0xf   : > { %p3250_p8 = por %p92_p5, %p91_p3  ;;  %p151_p10 = scmp.eq.s32.totalorder %s2456_s19, 1 }
  0x10   : > { %p3254_p9 = por %p145_p6, %p85_p1  ;;  %p2819_p13 = scmp.lt.s32.totalorder %s3175_s17, 2 }
  0x11   : > { %s4762_s24 = scalar_select %p3250_p8, 1, 0 }
  0x12   : > { %s4763_s25 = scalar_select %p3254_p9, 1, 0 }
  0x13   : > { %s3259_s26 = scalar_select %p76_p7, %s3163_s14, %s78_s21  }
  0x14   : > { %p3261_p11 = por %p151_p10, %p91_p3  ;;  %s3268_s28 = sand.u32 1, %s3163_s14  }
  0x15   : > { %s2459_s29 = sshll.u32 %s3268_s28, 4  ;;  %s2797_s30 = sshll.u32 %s3171_s16, 8 }
  0x16   : > { %s4764_s27 = scalar_select %p3261_p11, 1, 0 }
  0x17   : > { %s3275_s6 = scalar_lea.hbm %s4746_s1, %s2797_s30  ;;  %s188_s7 = scalar_lea.vmem [#allocation2], %s2459_s29 }
  0x18   : > { %s198_s8 = sshll.u32 %s188_s7, 4  ;;  %p3281_p0 = pnand %p2819_p13, %p3244_p4  ;;  %s3277_s8 = int_to_ptr.vmem [resolvable:$true] %s198_s8 }
  0x19   : > { %s185_s10 = scalar_lea.sflag [#allocation3], %s3268_s28  ;;  %s3029_s11 = scalar_lea.hbm %s3275_s6, 256 }
  0x1a   : > { %p3030_p3 = scmp.ne.s32.totalorder %s3275_s6, %s3029_s11  ;;  %p3031_p5 = pneg %p3281_p0 }
  0x1b   : > { %s3034_s21 = scalar_lea.hbm %s4746_s1, 512  ;;  %p3035_p4 = scmp.lt.u32.totalorder %s3275_s6, %s4746_s1 }
  0x1c   : > { %p3032_p6 = pnand %p3031_p5, %p3030_p3  ;;  %p3036_p10 = scmp.lt.u32.totalorder %s3034_s21, %s3029_s11 }
  0x1d   : > { %p3038_p12 = scmp.lt.u32.totalorder %s3029_s11, %s3275_s6 }
  0x1e   : > { %p3033_p7 = pneg %p3032_p6  ;;  %p3037_p13 = por %p3036_p10, %p3035_p4 }
  0x20   : > { %p3039_p1 = por %p3038_p12, %p3037_p13 }
  0x22   : > { %p3040_p2 = pnand %p3039_p1, %p3033_p7 }
  0x24   : > { %3043 = shalt.err (!%p3040_p2)
}
  0x25   : > { %s3044_s29 = scalar_lea.vmem %s3277_s8, 256  ;;  %s3177_s30 = smov [#allocation2]  }
  0x26   : > { %p3045_p3 = scmp.ne.s32.totalorder %s3277_s8, %s3044_s29  ;;  %s3049_s4 = sshll.u32 %s3177_s30, 4  ;;  %s3050_s4 = int_to_ptr.vmem [resolvable:$false] %s3049_s4 }
  0x27   : > { %s3051_s5 = scalar_lea.vmem %s3050_s4, 512  ;;  %p3052_p9 = scmp.lt.s32.totalorder %s3277_s8, %s3050_s4 }
  0x28   : > { %p3047_p6 = pnand %p3045_p3, %p3031_p5  ;;  %p3053_p4 = scmp.lt.s32.totalorder %s3051_s5, %s3044_s29 }
  0x2a   : > { %p3048_p11 = pneg %p3047_p6  ;;  %p3054_p10 = por %p3053_p4, %p3052_p9 }
  0x2c   : > { %p3055_p12 = pnand %p3054_p10, %p3048_p11 }
  0x2e   : > { %3058 = shalt.err (!%p3055_p12)
}
  0x2f   : > { %2811 = dma.hbm_to_vmem [thread:$0]  (!%p3281_p0), %s3275_s6, 256, %s3277_s8, %s185_s10  }
  0x30   : > { %p4766_p1 = scmp.lt.s32.totalorder %s3175_s17, 3  ;;  %p4767_p2 = scmp.ge.s32.totalorder %s3175_s17, 1 }
  0x31   : > { %s2462_s11 = sshll.u32 %s3268_s28, 1  ;;  %s2463_s18 = sshll.u32 %s3171_s16, 5 }
  0x32   : > { %p3317_p7 = pnand %p4767_p2, %p4766_p1  ;;  %s3326_s22 = scalar_lea.hbm %s4747_s2, %s2463_s18 }
  0x33   : > { %s209_s23 = scalar_lea.vmem [#allocation5], %s2462_s11  ;;  %s206_s6 = scalar_lea.sflag [#allocation6], %s3268_s28 }
  0x34   : > { %s4768_s7 = scalar_select %p3317_p7, 1, 0 }
  0x35   : > { %s216_s29 = sshll.u32 %s209_s23, 4  ;;  %s3059_s8 = scalar_lea.hbm %s3326_s22, 32  ;;  %s217_s29 = int_to_ptr.vmem [resolvable:$true] %s216_s29 }
  0x36   : > { %p3060_p9 = scmp.ne.s32.totalorder %s3326_s22, %s3059_s8  ;;  %s3064_s4 = scalar_lea.hbm %s4747_s2, 64 }
  0x37   : > { %p3065_p3 = scmp.lt.u32.totalorder %s3326_s22, %s4747_s2  ;;  %p3066_p6 = scmp.lt.u32.totalorder %s3064_s4, %s3059_s8 }
  0x38   : > { %p3062_p11 = pnand %p3060_p9, %p3031_p5  ;;  %p3068_p10 = scmp.lt.u32.totalorder %s3059_s8, %s3326_s22 }
  0x39   : > { %p3067_p4 = por %p3066_p6, %p3065_p3 }
  0x3a   : > { %p3063_p13 = pneg %p3062_p11 }
  0x3b   : > { %p3069_p12 = por %p3068_p10, %p3067_p4 }
  0x3d   : > { %p3070_p1 = pnand %p3069_p12, %p3063_p13 }
  0x3f   : > { %3073 = shalt.err (!%p3070_p1)
}
  0x40   : > { %s3074_s28 = scalar_lea.vmem %s217_s29, 32  ;;  %s3178_s11 = smov [#allocation5]  }
  0x41   : > { %p3075_p2 = scmp.ne.s32.totalorder %s217_s29, %s3074_s28  ;;  %s3079_s19 = sshll.u32 %s3178_s11, 4  ;;  %s3080_s19 = int_to_ptr.vmem [resolvable:$false] %s3079_s19 }
  0x42   : > { %s3081_s21 = scalar_lea.vmem %s3080_s19, 64  ;;  %p3082_p8 = scmp.lt.s32.totalorder %s217_s29, %s3080_s19 }
  0x43   : > { %p3077_p9 = pnand %p3075_p2, %p3031_p5  ;;  %p3083_p7 = scmp.lt.s32.totalorder %s3081_s21, %s3074_s28 }
  0x45   : > { %p3078_p11 = pneg %p3077_p9  ;;  %p3084_p3 = por %p3083_p7, %p3082_p8 }
  0x47   : > { %p3085_p6 = pnand %p3084_p3, %p3078_p11 }
  0x49   : > { %3088 = shalt.err (!%p3085_p6)
}
  0x4a   : > { %2814 = dma.hbm_to_vmem [thread:$0]  (!%p3281_p0), %s3326_s22, 32, %s217_s29, %s206_s6  }
  0x4b   : > { %p4769_p13 = scmp.ne.s32.totalorder %s4768_s7, 0 }
  0x4d   : > { %225 = sbr.rel (%p4769_p13) target bundleno = 517 (0x205), region = 32 }
  0x54   : > { %s3351_s23 = sand.u32 1, %s3159_s13   ;;  %p4770_p5 = scmp.ne.s32.totalorder %s4762_s24, 0 }
  0x55   : > { %s2465_s8 = sshll.u32 %s3351_s23, 4  ;;  %s228_s10 = scalar_lea.sflag [#allocation3], %s3351_s23 }
  0x56   : > { %s231_s30 = scalar_lea.vmem [#allocation2], %s2465_s8 }
  0x57   : > { %3142 = dma.done.wait (%p4770_p5), %s228_s10, 256  }
  0x58   : > { %3144 = vsyncadd (%p4770_p5), %s228_s10, 4294967040  ;;  %s2466_s9 = sshll.u32 %s3351_s23, 1  ;;  %s237_s7 = scalar_lea.sflag [#allocation6], %s3351_s23 }
  0x59   : > { %s240_s22 = scalar_lea.vmem [#allocation5], %s2466_s9 }
  0x5a   : > { %3146 = dma.done.wait (%p4770_p5), %s237_s7, 32  }
  0x5b   : > { %3148 = vsyncadd (%p4770_p5), %s237_s7, 4294967264  ;;  %p278_p8 = scmp.lt.s32.totalorder %s3167_s15, 1  ;;  %v3179_v0 = vmov 0.0   ;;  %v323_v1 = vld [vmem:[%s231_s30 + $0x8] sm:$0xff]  ;;  %v322_v2 = vld [vmem:[%s231_s30] sm:$0xff]  ;;  %vm654_vm0 = vcmask 64512  }
  0x5c   : > { %815 = vmatprep.mubr.f32.mxu0 %v3179_v0  ;;  %911 = vmatprep.mubr.f32.mxu1 %v3179_v0  ;;  %v3377_v4 = vld [vmem:[%s240_s22] ss:$0 sm:$0xff]  ;;  %v3380_v6 = vld [vmem:[%s240_s22 + $0x1] ss:$0 sm:$0xff]  ;;  %s2467_s24 = sshll.u32 %s3351_s23, 11  ;;  %s2799_s11 = sshll.u32 %s3167_s15, 15 }
  0x5d   : > { %s279_s29 = scalar_select %p278_p8, %s3167_s15, 1  ;;  %751 = vmatprep.subr.mxu0 %v323_v1  ;;  %2800 = vmatprep.subr.mxu1 %v323_v1 }
  0x5e   : > { %752 = vmatpush1.msra.mxu0 %v322_v2  ;;  %2801 = vmatpush1.msra.mxu1 %v322_v2  ;;  %s3623_s28 = scalar_lea.vmem [#allocation7], %s2467_s24  ;;  %s4690_s8 = scalar_lea.hbm %s4748_s3, %s2799_s11 }
  0x5f   : > { %s2798_s6 = sshll.u32 %s279_s29, 8  ;;  %1398 = vmatprep.subr.mxu1 %v323_v1  ;;  %1917 = vmatprep.subr.mxu0 %v323_v1  ;;  %591 = vst [vmem:[%s3623_s28 + $0x8] sm:$0xff] %v3179_v0  ;;  %593 = vst [vmem:[%s3623_s28 + $0x18] sm:$0xff] %v3179_v0  ;;  %s2322_s19 = sshll.u32 %s3623_s28, 4  ;;  %s4692_s19 = int_to_ptr.vmem [resolvable:$true] %s2322_s19 }
  0x60   : > { %s3372_s18 = scalar_lea.vmem %s4745_s0, %s2798_s6  ;;  %595 = vst [vmem:[%s3623_s28 + $0x28] sm:$0xff] %v3179_v0  ;;  %597 = vst [vmem:[%s3623_s28 + $0x38] sm:$0xff] %v3179_v0  ;;  %s2304_s10 = scalar_lea.sflag [#allocation4], %s3351_s23 }
  0x61   : > { %v3375_v3 = vld [vmem:[%s3372_s18] sm:$0xff]  ;;  %v307_v9 = vld [vmem:[%s3372_s18 + $0x88] sm:$0xff]  ;;  %v308_v13 = vld [vmem:[%s3372_s18 + $0x90] sm:$0xff]  ;;  %599 = vst [vmem:[%s3623_s28 + $0x48] sm:$0xff] %v3179_v0  ;;  %s3089_s30 = scalar_lea.vmem %s4692_s19, 32768  ;;  %p4807_p7 = scmp.ne.s32.totalorder %s4763_s25, 0 }
  0x62   : > { %v306_v5 = vld [vmem:[%s3372_s18 + $0x80] sm:$0xff]  ;;  %2502 = vmatmul.mubr.msk.f32.vlgmr.msra.gmra.mrb[0].mxu0 %vm654_vm0, %v3375_v3  ;;  %v3393_v10 = vld [vmem:[%s3372_s18 + $0x8] sm:$0xff]  ;;  %v3396_v11 = vmul.f32 %v3377_v4, %v307_v9  ;;  %v3399_v12 = vmul.f32 %v3380_v6, %v307_v9  ;;  %v3403_v14 = vmul.f32 %v3377_v4, %v308_v13  ;;  %v3406_v15 = vmul.f32 %v3380_v6, %v308_v13  ;;  %v309_v16 = vld [vmem:[%s3372_s18 + $0x98] sm:$0xff]  ;;  %p3090_p0 = scmp.ne.s32.totalorder %s4692_s19, %s3089_s30  ;;  %s3180_s9 = smov [#allocation7]  }
  0x63   : > { %v3383_v7 = vmul.f32 %v3377_v4, %v306_v5  ;;  %2518 = vmatmul.mubr.msk.f32.vlgmr.msra.gmra.mrb[0].mxu1 %vm654_vm0, %v306_v5  ;;  %v3389_v8 = vmul.f32 %v3380_v6, %v306_v5  ;;  %1918 = vmatpush1.msra.mxu0 %v322_v2  ;;  %v3412_v17 = vmul.f32 %v3377_v4, %v309_v16  ;;  %v310_v19 = vld [vmem:[%s3372_s18 + $0xa0] sm:$0xff]  ;;  %v3424_v20 = vld [vmem:[%s3372_s18 + $0x10] sm:$0xff]  ;;  %v311_v23 = vld [vmem:[%s3372_s18 + $0xa8] sm:$0xff]  ;;  %s3093_s7 = sshll.u32 %s3180_s9, 4  ;;  %s3094_s7 = int_to_ptr.vmem [resolvable:$false] %s3093_s7 }
  0x64   : > { %1399 = vmatpush1.msra.mxu1 %v322_v2  ;;  %821 = vmatprep.mubr.f32.mxu0 %v3179_v0  ;;  %v3418_v18 = vmul.f32 %v3380_v6, %v309_v16  ;;  %v3427_v21 = vmul.f32 %v3377_v4, %v310_v19  ;;  %v3430_v22 = vmul.f32 %v3380_v6, %v310_v19  ;;  %v312_v26 = vld [vmem:[%s3372_s18 + $0xb0] sm:$0xff]  ;;  %v313_v29 = vld [vmem:[%s3372_s18 + $0xb8] sm:$0xff]  ;;  %v314_v32 = vld [vmem:[%s3372_s18 + $0xc0] sm:$0xff]  ;;  %p3091_p4 = pnand %p3090_p0, %p4807_p7  ;;  %s3095_s22 = scalar_lea.vmem %s3094_s7, 65536 }
  0x65   : > { %917 = vmatprep.mubr.f32.mxu1 %v3179_v0  ;;  %v3434_v24 = vmul.f32 %v3377_v4, %v311_v23  ;;  %v3437_v25 = vmul.f32 %v3380_v6, %v311_v23  ;;  %v3441_v27 = vmul.f32 %v3377_v4, %v312_v26  ;;  %v3444_v28 = vmul.f32 %v3380_v6, %v312_v26  ;;  %v3460_v33 = vld [vmem:[%s3372_s18 + $0x18] sm:$0xff]  ;;  %v315_v35 = vld [vmem:[%s3372_s18 + $0xc8] sm:$0xff]  ;;  %v316_v38 = vld [vmem:[%s3372_s18 + $0xd0] sm:$0xff]  ;;  %p3096_p12 = scmp.lt.s32.totalorder %s4692_s19, %s3094_s7  ;;  %p3097_p1 = scmp.lt.s32.totalorder %s3095_s22, %s3089_s30 }
  0x66   : > { %2503 = vmatmul.mubr.msk.f32.gmra.mrb[2].mxu0 %vm654_vm0, %v3393_v10  ;;  %v3451_v30 = vmul.f32 %v3377_v4, %v313_v29  ;;  %v3454_v31 = vmul.f32 %v3380_v6, %v313_v29  ;;  %v3463_v34 = vmul.f32 %v3377_v4, %v314_v32  ;;  %v3467_v36 = vmul.f32 %v3380_v6, %v314_v32  ;;  %v317_v42 = vld [vmem:[%s3372_s18 + $0xd8] sm:$0xff]  ;;  %v3489_v43 = vld [vmem:[%s3372_s18 + $0x20] sm:$0xff]  ;;  %v319_v49 = vld [vmem:[%s3372_s18 + $0xe8] sm:$0xff]  ;;  %p3092_p10 = pneg %p3091_p4 }
  0x67   : > { %2519 = vmatmul.mubr.msk.f32.gmra.mrb[2].mxu1 %vm654_vm0, %v307_v9  ;;  %827 = vmatprep.mubr.f32.mxu0 %v3179_v0  ;;  %v3470_v37 = vmul.f32 %v3377_v4, %v315_v35  ;;  %v3474_v39 = vmul.f32 %v3380_v6, %v315_v35  ;;  %v3477_v40 = vmul.f32 %v3377_v4, %v316_v38  ;;  %v318_v46 = vld [vmem:[%s3372_s18 + $0xe0] sm:$0xff]  ;;  %v320_v52 = vld [vmem:[%s3372_s18 + $0xf0] sm:$0xff]  ;;  %v321_v55 = vld [vmem:[%s3372_s18 + $0xf8] sm:$0xff]  ;;  %p3098_p2 = por %p3097_p1, %p3096_p12 }
  0x68   : > { %923 = vmatprep.mubr.f32.mxu1 %v3179_v0  ;;  %v3483_v41 = vmul.f32 %v3380_v6, %v316_v38  ;;  %v3492_v44 = vmul.f32 %v3377_v4, %v317_v42  ;;  %v3495_v45 = vmul.f32 %v3380_v6, %v317_v42  ;;  %v3499_v47 = vmul.f32 %v3377_v4, %v318_v46  ;;  %v3525_v56 = vld [vmem:[%s3372_s18 + $0x28] sm:$0xff]  ;;  %v3539_v59 = vld [vmem:[%s3372_s18 + $0x30] sm:$0xff]  ;;  %v3547_v60 = vld [vmem:[%s3372_s18 + $0x38] sm:$0xff] }
  0x69   : > { %v3502_v48 = vmul.f32 %v3380_v6, %v318_v46  ;;  %v3506_v50 = vmul.f32 %v3377_v4, %v319_v49  ;;  %v3509_v51 = vmul.f32 %v3380_v6, %v319_v49  ;;  %v3516_v53 = vmul.f32 %v3377_v4, %v320_v52  ;;  %v3555_v61 = vld [vmem:[%s3372_s18 + $0x40] sm:$0xff]  ;;  %v3563_v62 = vld [vmem:[%s3372_s18 + $0x48] sm:$0xff]  ;;  %v3571_v63 = vld [vmem:[%s3372_s18 + $0x50] sm:$0xff]  ;;  %601 = vst [vmem:[%s3623_s28 + $0x58] sm:$0xff] %v3179_v0  ;;  %p3099_p9 = pnand %p3098_p2, %p3092_p10 }
  0x6a   : > { %2504 = vmatmul.mubr.msk.f32.gmra.mrb[4].mxu0 %vm654_vm0, %v3424_v20  ;;  %v3519_v54 = vmul.f32 %v3380_v6, %v320_v52  ;;  %v3528_v57 = vmul.f32 %v3377_v4, %v321_v55  ;;  %v3531_v58 = vmul.f32 %v3380_v6, %v321_v55  ;;  %v3579_v1 = vld [vmem:[%s3372_s18 + $0x58] sm:$0xff]  ;;  %v3587_v2 = vld [vmem:[%s3372_s18 + $0x60] sm:$0xff]  ;;  %v3595_v5 = vld [vmem:[%s3372_s18 + $0x68] sm:$0xff]  ;;  %603 = vst [vmem:[%s3623_s28 + $0x68] sm:$0xff] %v3179_v0 }
  0x6b   : > { %2520 = vmatmul.mubr.msk.f32.gmra.mrb[4].mxu1 %vm654_vm0, %v308_v13  ;;  %833 = vmatprep.mubr.f32.mxu0 %v3179_v0  ;;  %v3603_v9 = vld [vmem:[%s3372_s18 + $0x70] sm:$0xff]  ;;  %v3611_v13 = vld [vmem:[%s3372_s18 + $0x78] sm:$0xff]  ;;  %605 = vst [vmem:[%s3623_s28 + $0x78] sm:$0xff] %v3179_v0  ;;  %607 = vst [vmem:[%s3623_s28 + $0x88] sm:$0xff] %v3179_v0 }
  0x6c   : > { %929 = vmatprep.mubr.f32.mxu1 %v3179_v0  ;;  %609 = vst [vmem:[%s3623_s28 + $0x98] sm:$0xff] %v3179_v0  ;;  %611 = vst [vmem:[%s3623_s28 + $0xa8] sm:$0xff] %v3179_v0 }
  0x6d   : > { %613 = vst [vmem:[%s3623_s28 + $0xb8] sm:$0xff] %v3179_v0  ;;  %615 = vst [vmem:[%s3623_s28 + $0xc8] sm:$0xff] %v3179_v0 }
  0x6e   : > { %2505 = vmatmul.mubr.msk.f32.gmra.mrb[6].mxu0 %vm654_vm0, %v3460_v33  ;;  %617 = vst [vmem:[%s3623_s28 + $0xd8] sm:$0xff] %v3179_v0  ;;  %619 = vst [vmem:[%s3623_s28 + $0xe8] sm:$0xff] %v3179_v0 }
  0x6f   : > { %2521 = vmatmul.mubr.msk.f32.gmra.mrb[6].mxu1 %vm654_vm0, %v309_v16  ;;  %839 = vmatprep.mubr.f32.mxu0 %v3179_v0  ;;  %v1270_v16 = vmul.f32 %v3377_v4, %v3375_v3  ;;  %621 = vst [vmem:[%s3623_s28 + $0xf8] sm:$0xff] %v3179_v0  ;;  %622 = vst [vmem:[%s3623_s28 + $0x100] sm:$0xff] %v3179_v0 }
  0x70   : > { %935 = vmatprep.mubr.f32.mxu1 %v3179_v0  ;;  %624 = vst [vmem:[%s3623_s28 + $0x110] sm:$0xff] %v3179_v0  ;;  %626 = vst [vmem:[%s3623_s28 + $0x120] sm:$0xff] %v3179_v0 }
  0x71   : > { %628 = vst [vmem:[%s3623_s28 + $0x130] sm:$0xff] %v3179_v0  ;;  %630 = vst [vmem:[%s3623_s28 + $0x140] sm:$0xff] %v3179_v0 }
  0x72   : > { %2506 = vmatmul.mubr.msk.f32.gmra.mrb[8].mxu0 %vm654_vm0, %v3489_v43  ;;  %632 = vst [vmem:[%s3623_s28 + $0x150] sm:$0xff] %v3179_v0  ;;  %634 = vst [vmem:[%s3623_s28 + $0x160] sm:$0xff] %v3179_v0 }
  0x73   : > { %2522 = vmatmul.mubr.msk.f32.gmra.mrb[8].mxu1 %vm654_vm0, %v310_v19  ;;  %845 = vmatprep.mubr.f32.mxu0 %v3179_v0  ;;  %v1789_v19 = vmul.f32 %v3380_v6, %v3375_v3  ;;  %636 = vst [vmem:[%s3623_s28 + $0x170] sm:$0xff] %v3179_v0  ;;  %638 = vst [vmem:[%s3623_s28 + $0x180] sm:$0xff] %v3179_v0  ;;  %v1271_v3 = vmul.f32 %v3377_v4, %v3393_v10 }
  0x74   : > { %941 = vmatprep.mubr.f32.mxu1 %v3179_v0  ;;  %640 = vst [vmem:[%s3623_s28 + $0x190] sm:$0xff] %v3179_v0  ;;  %642 = vst [vmem:[%s3623_s28 + $0x1a0] sm:$0xff] %v3179_v0 }
  0x75   : > { %644 = vst [vmem:[%s3623_s28 + $0x1b0] sm:$0xff] %v3179_v0  ;;  %646 = vst [vmem:[%s3623_s28 + $0x1c0] sm:$0xff] %v3179_v0 }
  0x76   : > { %2507 = vmatmul.mubr.msk.f32.gmra.mrb[10].mxu0 %vm654_vm0, %v3525_v56  ;;  %648 = vst [vmem:[%s3623_s28 + $0x1d0] sm:$0xff] %v3179_v0  ;;  %650 = vst [vmem:[%s3623_s28 + $0x1e0] sm:$0xff] %v3179_v0 }
  0x77   : > { %2523 = vmatmul.mubr.msk.f32.gmra.mrb[10].mxu1 %vm654_vm0, %v311_v23  ;;  %851 = vmatprep.mubr.f32.mxu0 %v3179_v0  ;;  %652 = vst [vmem:[%s3623_s28 + $0x1f0] sm:$0xff] %v3179_v0  ;;  %v1790_v23 = vmul.f32 %v3380_v6, %v3393_v10  ;;  %v1273_v10 = vmul.f32 %v3377_v4, %v3460_v33 }
  0x78   : > { %947 = vmatprep.mubr.f32.mxu1 %v3179_v0 }
  0x7a   : > { %2508 = vmatmul.mubr.msk.f32.gmra.mrb[12].mxu0 %vm654_vm0, %v3539_v59 }
  0x7b   : > { %2524 = vmatmul.mubr.msk.f32.gmra.mrb[12].mxu1 %vm654_vm0, %v312_v26  ;;  %857 = vmatprep.mubr.f32.mxu0 %v3179_v0  ;;  %v1272_v26 = vmul.f32 %v3377_v4, %v3424_v20 }
  0x7c   : > { %953 = vmatprep.mubr.f32.mxu1 %v3179_v0 }
  0x7e   : > { %2509 = vmatmul.mubr.msk.f32.gmra.mrb[14].mxu0 %vm654_vm0, %v3547_v60 }
  0x7f   : > { %2525 = vmatmul.mubr.msk.f32.gmra.mrb[14].mxu1 %vm654_vm0, %v313_v29  ;;  %863 = vmatprep.mubr.f32.mxu0 %v3179_v0  ;;  %v1791_v29 = vmul.f32 %v3380_v6, %v3424_v20  ;;  %v1274_v20 = vmul.f32 %v3377_v4, %v3489_v43 }
  0x80   : > { %959 = vmatprep.mubr.f32.mxu1 %v3179_v0 }
  0x82   : > { %2510 = vmatmul.mubr.msk.f32.gmra.mrb[16].mxu0 %vm654_vm0, %v3555_v61 }
  0x83   : > { %2526 = vmatmul.mubr.msk.f32.gmra.mrb[16].mxu1 %vm654_vm0, %v314_v32  ;;  %869 = vmatprep.mubr.f32.mxu0 %v3179_v0  ;;  %v1792_v32 = vmul.f32 %v3380_v6, %v3460_v33  ;;  %v1275_v33 = vmul.f32 %v3377_v4, %v3525_v56 }
  0x84   : > { %965 = vmatprep.mubr.f32.mxu1 %v3179_v0 }
  0x86   : > { %2511 = vmatmul.mubr.msk.f32.gmra.mrb[18].mxu0 %vm654_vm0, %v3563_v62 }
  0x87   : > { %2527 = vmatmul.mubr.msk.f32.gmra.mrb[18].mxu1 %vm654_vm0, %v315_v35  ;;  %875 = vmatprep.mubr.f32.mxu0 %v3179_v0  ;;  %v1793_v35 = vmul.f32 %v3380_v6, %v3489_v43  ;;  %v1795_v43 = vmul.f32 %v3380_v6, %v3539_v59 }
  0x88   : > { %971 = vmatprep.mubr.f32.mxu1 %v3179_v0 }
  0x8a   : > { %2512 = vmatmul.mubr.msk.f32.gmra.mrb[20].mxu0 %vm654_vm0, %v3571_v63 }
  0x8b   : > { %2528 = vmatmul.mubr.msk.f32.gmra.mrb[20].mxu1 %vm654_vm0, %v316_v38  ;;  %881 = vmatprep.mubr.f32.mxu0 %v3179_v0  ;;  %v1794_v38 = vmul.f32 %v3380_v6, %v3525_v56  ;;  %v1279_v56 = vmul.f32 %v3377_v4, %v3563_v62 }
  0x8c   : > { %977 = vmatprep.mubr.f32.mxu1 %v3179_v0 }
  0x8e   : > { %2513 = vmatmul.mubr.msk.f32.gmra.mrb[22].mxu0 %vm654_vm0, %v3579_v1 }
  0x8f   : > { %2529 = vmatmul.mubr.msk.f32.gmra.mrb[22].mxu1 %vm654_vm0, %v317_v42  ;;  %887 = vmatprep.mubr.f32.mxu0 %v3179_v0  ;;  %v1276_v42 = vmul.f32 %v3377_v4, %v3539_v59  ;;  %v1798_v59 = vmul.f32 %v3380_v6, %v3563_v62  ;;  %v1281_v62 = vmul.f32 %v3377_v4, %v3579_v1 }
  0x90   : > { %983 = vmatprep.mubr.f32.mxu1 %v3179_v0 }
  0x92   : > { %2514 = vmatmul.mubr.msk.f32.gmra.mrb[24].mxu0 %vm654_vm0, %v3587_v2 }
  0x93   : > { %2530 = vmatmul.mubr.msk.f32.gmra.mrb[24].mxu1 %vm654_vm0, %v318_v46  ;;  %893 = vmatprep.mubr.f32.mxu0 %v3179_v0  ;;  %v1277_v46 = vmul.f32 %v3377_v4, %v3547_v60 }
  0x94   : > { %989 = vmatprep.mubr.f32.mxu1 %v3179_v0 }
  0x96   : > { %2515 = vmatmul.mubr.msk.f32.gmra.mrb[26].mxu0 %vm654_vm0, %v3595_v5 }
  0x97   : > { %2531 = vmatmul.mubr.msk.f32.gmra.mrb[26].mxu1 %vm654_vm0, %v319_v49  ;;  %899 = vmatprep.mubr.f32.mxu0 %v3179_v0  ;;  %v1796_v49 = vmul.f32 %v3380_v6, %v3547_v60  ;;  %v1280_v60 = vmul.f32 %v3377_v4, %v3571_v63 }
  0x98   : > { %995 = vmatprep.mubr.f32.mxu1 %v3179_v0 }
  0x9a   : > { %2516 = vmatmul.mubr.msk.f32.gmra.mrb[28].mxu0 %vm654_vm0, %v3603_v9 }
  0x9b   : > { %2532 = vmatmul.mubr.msk.f32.gmra.mrb[28].mxu1 %vm654_vm0, %v320_v52  ;;  %905 = vmatprep.mubr.f32.mxu0 %v3179_v0  ;;  %v1278_v52 = vmul.f32 %v3377_v4, %v3555_v61 }
  0x9c   : > { %1001 = vmatprep.mubr.f32.mxu1 %v3179_v0 }
  0x9e   : > { %2517 = vmatmul.mubr.msk.f32.gmra.mrb[30].mxu0 %vm654_vm0, %v3611_v13 }
  0x9f   : > { %2533 = vmatmul.mubr.msk.f32.gmra.mrb[30].mxu1 %vm654_vm0, %v321_v55  ;;  %1981 = vmatprep.mubr.f32.mxu0 %v3179_v0  ;;  %v1797_v55 = vmul.f32 %v3380_v6, %v3555_v61  ;;  %v1799_v61 = vmul.f32 %v3380_v6, %v3571_v63  ;;  %v1282_v63 = vmul.f32 %v3377_v4, %v3587_v2 }
  0xa0   : > { %1462 = vmatprep.mubr.f32.mxu1 %v3179_v0 }
  0xa2   : > { %2696 = vmatmul.mubr.msk.f32.vlgmr.msra.gmra.mrb[32].mxu0 %vm654_vm0, %v1789_v19  ;;  %v1801_v19 = vmul.f32 %v3380_v6, %v3587_v2  ;;  %v1284_v2 = vmul.f32 %v3377_v4, %v3603_v9 }
  0xa3   : > { %2599 = vmatmul.mubr.msk.f32.vlgmr.msra.gmra.mrb[32].mxu1 %vm654_vm0, %v1270_v16  ;;  %1987 = vmatprep.mubr.f32.mxu0 %v3179_v0  ;;  %v1800_v16 = vmul.f32 %v3380_v6, %v3579_v1  ;;  %v1283_v1 = vmul.f32 %v3377_v4, %v3595_v5 }
  0xa4   : > { %1468 = vmatprep.mubr.f32.mxu1 %v3179_v0 }
  0xa6   : > { %2697 = vmatmul.mubr.msk.f32.gmra.mrb[34].mxu0 %vm654_vm0, %v1790_v23  ;;  %v1803_v23 = vmul.f32 %v3380_v6, %v3603_v9 }
  0xa7   : > { %2600 = vmatmul.mubr.msk.f32.gmra.mrb[34].mxu1 %vm654_vm0, %v1271_v3  ;;  %1993 = vmatprep.mubr.f32.mxu0 %v3179_v0  ;;  %v1802_v3 = vmul.f32 %v3380_v6, %v3595_v5  ;;  %v1285_v5 = vmul.f32 %v3377_v4, %v3611_v13 }
  0xa8   : > { %1474 = vmatprep.mubr.f32.mxu1 %v3179_v0 }
  0xaa   : > { %2698 = vmatmul.mubr.msk.f32.gmra.mrb[36].mxu0 %vm654_vm0, %v1791_v29 }
  0xab   : > { %2601 = vmatmul.mubr.msk.f32.gmra.mrb[36].mxu1 %vm654_vm0, %v1272_v26  ;;  %1999 = vmatprep.mubr.f32.mxu0 %v3179_v0  ;;  %v1804_v26 = vmul.f32 %v3380_v6, %v3611_v13 }
  0xac   : > { %1480 = vmatprep.mubr.f32.mxu1 %v3179_v0 }
  0xae   : > { %2699 = vmatmul.mubr.msk.f32.gmra.mrb[38].mxu0 %vm654_vm0, %v1792_v32 }
  0xaf   : > { %2602 = vmatmul.mubr.msk.f32.gmra.mrb[38].mxu1 %vm654_vm0, %v1273_v10  ;;  %2005 = vmatprep.mubr.f32.mxu0 %v3179_v0 }
  0xb0   : > { %1486 = vmatprep.mubr.f32.mxu1 %v3179_v0 }
  0xb2   : > { %2700 = vmatmul.mubr.msk.f32.gmra.mrb[40].mxu0 %vm654_vm0, %v1793_v35 }
  0xb3   : > { %2603 = vmatmul.mubr.msk.f32.gmra.mrb[40].mxu1 %vm654_vm0, %v1274_v20  ;;  %2011 = vmatprep.mubr.f32.mxu0 %v3179_v0 }
  0xb4   : > { %1492 = vmatprep.mubr.f32.mxu1 %v3179_v0 }
  0xb6   : > { %2701 = vmatmul.mubr.msk.f32.gmra.mrb[42].mxu0 %vm654_vm0, %v1794_v38 }
  0xb7   : > { %2604 = vmatmul.mubr.msk.f32.gmra.mrb[42].mxu1 %vm654_vm0, %v1275_v33  ;;  %2017 = vmatprep.mubr.f32.mxu0 %v3179_v0 }
  0xb8   : > { %1498 = vmatprep.mubr.f32.mxu1 %v3179_v0 }
  0xba   : > { %2702 = vmatmul.mubr.msk.f32.gmra.mrb[44].mxu0 %vm654_vm0, %v1795_v43 }
  0xbb   : > { %2605 = vmatmul.mubr.msk.f32.gmra.mrb[44].mxu1 %vm654_vm0, %v1276_v42  ;;  %2023 = vmatprep.mubr.f32.mxu0 %v3179_v0 }
  0xbc   : > { %1504 = vmatprep.mubr.f32.mxu1 %v3179_v0 }
  0xbe   : > { %2703 = vmatmul.mubr.msk.f32.gmra.mrb[46].mxu0 %vm654_vm0, %v1796_v49 }
  0xbf   : > { %2606 = vmatmul.mubr.msk.f32.gmra.mrb[46].mxu1 %vm654_vm0, %v1277_v46  ;;  %2029 = vmatprep.mubr.f32.mxu0 %v3179_v0 }
  0xc0   : > { %1510 = vmatprep.mubr.f32.mxu1 %v3179_v0 }
  0xc2   : > { %2704 = vmatmul.mubr.msk.f32.gmra.mrb[48].mxu0 %vm654_vm0, %v1797_v55 }
  0xc3   : > { %2607 = vmatmul.mubr.msk.f32.gmra.mrb[48].mxu1 %vm654_vm0, %v1278_v52  ;;  %2035 = vmatprep.mubr.f32.mxu0 %v3179_v0 }
  0xc4   : > { %1516 = vmatprep.mubr.f32.mxu1 %v3179_v0 }
  0xc6   : > { %2705 = vmatmul.mubr.msk.f32.gmra.mrb[50].mxu0 %vm654_vm0, %v1798_v59 }
  0xc7   : > { %2608 = vmatmul.mubr.msk.f32.gmra.mrb[50].mxu1 %vm654_vm0, %v1279_v56  ;;  %2041 = vmatprep.mubr.f32.mxu0 %v3179_v0 }
  0xc8   : > { %1522 = vmatprep.mubr.f32.mxu1 %v3179_v0 }
  0xca   : > { %2706 = vmatmul.mubr.msk.f32.gmra.mrb[52].mxu0 %vm654_vm0, %v1799_v61 }
  0xcb   : > { %2609 = vmatmul.mubr.msk.f32.gmra.mrb[52].mxu1 %vm654_vm0, %v1280_v60  ;;  %2047 = vmatprep.mubr.f32.mxu0 %v3179_v0 }
  0xcc   : > { %1528 = vmatprep.mubr.f32.mxu1 %v3179_v0 }
  0xce   : > { %2707 = vmatmul.mubr.msk.f32.gmra.mrb[54].mxu0 %vm654_vm0, %v1800_v16 }
  0xcf   : > { %2610 = vmatmul.mubr.msk.f32.gmra.mrb[54].mxu1 %vm654_vm0, %v1281_v62  ;;  %2053 = vmatprep.mubr.f32.mxu0 %v3179_v0 }
  0xd0   : > { %1534 = vmatprep.mubr.f32.mxu1 %v3179_v0 }
  0xd2   : > { %2708 = vmatmul.mubr.msk.f32.gmra.mrb[56].mxu0 %vm654_vm0, %v1801_v19 }
  0xd3   : > { %2611 = vmatmul.mubr.msk.f32.gmra.mrb[56].mxu1 %vm654_vm0, %v1282_v63  ;;  %2059 = vmatprep.mubr.f32.mxu0 %v3179_v0 }
  0xd4   : > { %1540 = vmatprep.mubr.f32.mxu1 %v3179_v0 }
  0xd6   : > { %2709 = vmatmul.mubr.msk.f32.gmra.mrb[58].mxu0 %vm654_vm0, %v1802_v3 }
  0xd7   : > { %2612 = vmatmul.mubr.msk.f32.gmra.mrb[58].mxu1 %vm654_vm0, %v1283_v1  ;;  %2065 = vmatprep.mubr.f32.mxu0 %v3179_v0 }
  0xd8   : > { %1546 = vmatprep.mubr.f32.mxu1 %v3179_v0 }
  0xda   : > { %2710 = vmatmul.mubr.msk.f32.gmra.mrb[60].mxu0 %vm654_vm0, %v1803_v23 }
  0xdb   : > { %2613 = vmatmul.mubr.msk.f32.gmra.mrb[60].mxu1 %vm654_vm0, %v1284_v2  ;;  %2071 = vmatprep.mubr.f32.mxu0 %v3179_v0 }
  0xdc   : > { %1552 = vmatprep.mubr.f32.mxu1 %v3179_v0 }
  0xde   : > { %2711 = vmatmul.mubr.msk.f32.gmra.mrb[62].mxu0 %vm654_vm0, %v1804_v26 }
  0xdf   : > { %2614 = vmatmul.mubr.msk.f32.gmra.mrb[62].mxu1 %vm654_vm0, %v1285_v5  ;;  %2077 = vmatprep.mubr.f32.mxu0 %v3179_v0 }
  0xe0   : > { %1558 = vmatprep.mubr.f32.mxu1 %v3179_v0 }
  0xe2   : > { %2712 = vmatmul.mubr.msk.f32.gmra.mrb[64].mxu0 %vm654_vm0, %v3389_v8 }
  0xe3   : > { %2615 = vmatmul.mubr.msk.f32.gmra.mrb[64].mxu1 %vm654_vm0, %v3383_v7  ;;  %2083 = vmatprep.mubr.f32.mxu0 %v3179_v0 }
  0xe4   : > { %1564 = vmatprep.mubr.f32.mxu1 %v3179_v0 }
  0xe6   : > { %2713 = vmatmul.mubr.msk.f32.gmra.mrb[66].mxu0 %vm654_vm0, %v3399_v12 }
  0xe7   : > { %2616 = vmatmul.mubr.msk.f32.gmra.mrb[66].mxu1 %vm654_vm0, %v3396_v11  ;;  %2089 = vmatprep.mubr.f32.mxu0 %v3179_v0 }
  0xe8   : > { %1570 = vmatprep.mubr.f32.mxu1 %v3179_v0 }
  0xea   : > { %2714 = vmatmul.mubr.msk.f32.gmra.mrb[68].mxu0 %vm654_vm0, %v3406_v15 }
  0xeb   : > { %2617 = vmatmul.mubr.msk.f32.gmra.mrb[68].mxu1 %vm654_vm0, %v3403_v14  ;;  %2095 = vmatprep.mubr.f32.mxu0 %v3179_v0 }
  0xec   : > { %1576 = vmatprep.mubr.f32.mxu1 %v3179_v0 }
  0xee   : > { %2715 = vmatmul.mubr.msk.f32.gmra.mrb[70].mxu0 %vm654_vm0, %v3418_v18 }
  0xef   : > { %2618 = vmatmul.mubr.msk.f32.gmra.mrb[70].mxu1 %vm654_vm0, %v3412_v17  ;;  %2101 = vmatprep.mubr.f32.mxu0 %v3179_v0 }
  0xf0   : > { %1582 = vmatprep.mubr.f32.mxu1 %v3179_v0 }
  0xf2   : > { %2716 = vmatmul.mubr.msk.f32.gmra.mrb[72].mxu0 %vm654_vm0, %v3430_v22 }
  0xf3   : > { %2619 = vmatmul.mubr.msk.f32.gmra.mrb[72].mxu1 %vm654_vm0, %v3427_v21  ;;  %2107 = vmatprep.mubr.f32.mxu0 %v3179_v0 }
  0xf4   : > { %1588 = vmatprep.mubr.f32.mxu1 %v3179_v0 }
  0xf6   : > { %2717 = vmatmul.mubr.msk.f32.gmra.mrb[74].mxu0 %vm654_vm0, %v3437_v25 }
  0xf7   : > { %2620 = vmatmul.mubr.msk.f32.gmra.mrb[74].mxu1 %vm654_vm0, %v3434_v24  ;;  %2113 = vmatprep.mubr.f32.mxu0 %v3179_v0 }
  0xf8   : > { %1594 = vmatprep.mubr.f32.mxu1 %v3179_v0 }
  0xfa   : > { %2718 = vmatmul.mubr.msk.f32.gmra.mrb[76].mxu0 %vm654_vm0, %v3444_v28 }
  0xfb   : > { %2621 = vmatmul.mubr.msk.f32.gmra.mrb[76].mxu1 %vm654_vm0, %v3441_v27  ;;  %2119 = vmatprep.mubr.f32.mxu0 %v3179_v0 }
  0xfc   : > { %1600 = vmatprep.mubr.f32.mxu1 %v3179_v0 }
  0xfe   : > { %2719 = vmatmul.mubr.msk.f32.gmra.mrb[78].mxu0 %vm654_vm0, %v3454_v31 }
  0xff   : > { %2622 = vmatmul.mubr.msk.f32.gmra.mrb[78].mxu1 %vm654_vm0, %v3451_v30  ;;  %2125 = vmatprep.mubr.f32.mxu0 %v3179_v0 }
 0x100   : > { %1606 = vmatprep.mubr.f32.mxu1 %v3179_v0 }
 0x102   : > { %2720 = vmatmul.mubr.msk.f32.gmra.mrb[80].mxu0 %vm654_vm0, %v3467_v36 }
 0x103   : > { %2623 = vmatmul.mubr.msk.f32.gmra.mrb[80].mxu1 %vm654_vm0, %v3463_v34  ;;  %2131 = vmatprep.mubr.f32.mxu0 %v3179_v0 }
 0x104   : > { %1612 = vmatprep.mubr.f32.mxu1 %v3179_v0 }
 0x106   : > { %2721 = vmatmul.mubr.msk.f32.gmra.mrb[82].mxu0 %vm654_vm0, %v3474_v39 }
 0x107   : > { %2624 = vmatmul.mubr.msk.f32.gmra.mrb[82].mxu1 %vm654_vm0, %v3470_v37  ;;  %2137 = vmatprep.mubr.f32.mxu0 %v3179_v0 }
 0x108   : > { %1618 = vmatprep.mubr.f32.mxu1 %v3179_v0 }
 0x10a   : > { %2722 = vmatmul.mubr.msk.f32.gmra.mrb[84].mxu0 %vm654_vm0, %v3483_v41 }
 0x10b   : > { %2625 = vmatmul.mubr.msk.f32.gmra.mrb[84].mxu1 %vm654_vm0, %v3477_v40  ;;  %2143 = vmatprep.mubr.f32.mxu0 %v3179_v0 }
 0x10c   : > { %1624 = vmatprep.mubr.f32.mxu1 %v3179_v0 }
 0x10e   : > { %2723 = vmatmul.mubr.msk.f32.gmra.mrb[86].mxu0 %vm654_vm0, %v3495_v45 }
 0x10f   : > { %2626 = vmatmul.mubr.msk.f32.gmra.mrb[86].mxu1 %vm654_vm0, %v3492_v44  ;;  %2149 = vmatprep.mubr.f32.mxu0 %v3179_v0 }
 0x110   : > { %1630 = vmatprep.mubr.f32.mxu1 %v3179_v0 }
 0x112   : > { %2724 = vmatmul.mubr.msk.f32.gmra.mrb[88].mxu0 %vm654_vm0, %v3502_v48 }
 0x113   : > { %2627 = vmatmul.mubr.msk.f32.gmra.mrb[88].mxu1 %vm654_vm0, %v3499_v47  ;;  %2155 = vmatprep.mubr.f32.mxu0 %v3179_v0 }
 0x114   : > { %1636 = vmatprep.mubr.f32.mxu1 %v3179_v0 }
 0x116   : > { %2725 = vmatmul.mubr.msk.f32.gmra.mrb[90].mxu0 %vm654_vm0, %v3509_v51 }
 0x117   : > { %2628 = vmatmul.mubr.msk.f32.gmra.mrb[90].mxu1 %vm654_vm0, %v3506_v50  ;;  %2161 = vmatprep.mubr.f32.mxu0 %v3179_v0 }
 0x118   : > { %1642 = vmatprep.mubr.f32.mxu1 %v3179_v0 }
 0x11a   : > { %2726 = vmatmul.mubr.msk.f32.gmra.mrb[92].mxu0 %vm654_vm0, %v3519_v54 }
 0x11b   : > { %2629 = vmatmul.mubr.msk.f32.gmra.mrb[92].mxu1 %vm654_vm0, %v3516_v53  ;;  %2167 = vmatprep.mubr.f32.mxu0 %v3179_v0 }
 0x11c   : > { %1648 = vmatprep.mubr.f32.mxu1 %v3179_v0 }
 0x11e   : > { %2727 = vmatmul.mubr.msk.f32.gmra.mrb[94].mxu0 %vm654_vm0, %v3531_v58 }
 0x11f   : > { %2630 = vmatmul.mubr.msk.f32.gmra.mrb[94].mxu1 %vm654_vm0, %v3528_v57 }
 0x135   : > { %v3907_v4 = vpop.f32.mrb[0].mxu0 }
 0x136   : > { %v3909_v6 = vpop.f32.mrb[0].mxu1  ;;  %2534 = vst [vmem:[%s3623_s28 + $0x200] sm:$0xff] %v3907_v4  ;;  %v3915_v7 = vpop.f32.mrb[1].mxu0  ;;  %v1073_v20 = vadd.f32 1e-08, %v3907_v4 }
 0x137   : > { %4771 = vst [vmem:[#allocation11_spill] sm:$0xff] %v3909_v6  ;;  %2566 = vst [vmem:[%s3623_s28 + $0x300] sm:$0xff] %v3909_v6  ;;  %v3917_v0 = vpop.f32.mrb[1].mxu1  ;;  %v1074_v35 = vadd.f32 1e-08, %v3915_v7 }
 0x138   : > { %4772 = vst [vmem:[#allocation12_spill] sm:$0xff] %v3917_v0  ;;  %2535 = vst [vmem:[%s3623_s28 + $0x208] sm:$0xff] %v3915_v7  ;;  %2872 = vrcp.f32 %v1073_v20 }
 0x139   : > { %2567 = vst [vmem:[%s3623_s28 + $0x308] sm:$0xff] %v3917_v0  ;;  %v3923_v8 = vpop.f32.mrb[2].mxu0  ;;  %2874 = vrcp.f32 %v1074_v35 }
 0x13a   : > { %v3925_v11 = vpop.f32.mrb[2].mxu1  ;;  %2536 = vst [vmem:[%s3623_s28 + $0x210] sm:$0xff] %v3923_v8  ;;  %v3931_v12 = vpop.f32.mrb[3].mxu0  ;;  %v1075_v33 = vadd.f32 1e-08, %v3923_v8 }
 0x13b   : > { %4773 = vst [vmem:[#allocation13_spill] sm:$0xff] %v3925_v11  ;;  %2568 = vst [vmem:[%s3623_s28 + $0x310] sm:$0xff] %v3925_v11  ;;  %v3933_v14 = vpop.f32.mrb[3].mxu1  ;;  %v1076_v43 = vadd.f32 1e-08, %v3931_v12 }
 0x13c   : > { %4774 = vst [vmem:[#allocation14_spill] sm:$0xff] %v3933_v14  ;;  %2537 = vst [vmem:[%s3623_s28 + $0x218] sm:$0xff] %v3931_v12  ;;  %2876 = vrcp.f32 %v1075_v33 }
 0x13d   : > { %2569 = vst [vmem:[%s3623_s28 + $0x318] sm:$0xff] %v3933_v14  ;;  %v3939_v15 = vpop.f32.mrb[4].mxu0  ;;  %2878 = vrcp.f32 %v1076_v43 }
 0x13e   : > { %v925_v17 = vpop.f32.mrb[4].mxu1  ;;  %2538 = vst [vmem:[%s3623_s28 + $0x220] sm:$0xff] %v3939_v15  ;;  %v3944_v18 = vpop.f32.mrb[5].mxu0  ;;  %v1077_v52 = vadd.f32 1e-08, %v3939_v15 }
 0x13f   : > { %2570 = vst [vmem:[%s3623_s28 + $0x320] sm:$0xff] %v925_v17  ;;  %v927_v21 = vpop.f32.mrb[5].mxu1  ;;  %2539 = vst [vmem:[%s3623_s28 + $0x228] sm:$0xff] %v3944_v18  ;;  %v1078_v55 = vadd.f32 1e-08, %v3944_v18 }
 0x140   : > { %2571 = vst [vmem:[%s3623_s28 + $0x328] sm:$0xff] %v927_v21  ;;  %2880 = vrcp.f32 %v1077_v52 }
 0x141   : > { %v3949_v22 = vpop.f32.mrb[6].mxu0  ;;  %2882 = vrcp.f32 %v1078_v55 }
 0x142   : > { %v931_v24 = vpop.f32.mrb[6].mxu1  ;;  %2540 = vst [vmem:[%s3623_s28 + $0x230] sm:$0xff] %v3949_v22  ;;  %v3954_v25 = vpop.f32.mrb[7].mxu0  ;;  %v1079_v56 = vadd.f32 1e-08, %v3949_v22 }
 0x143   : > { %2572 = vst [vmem:[%s3623_s28 + $0x330] sm:$0xff] %v931_v24  ;;  %v933_v27 = vpop.f32.mrb[7].mxu1  ;;  %2541 = vst [vmem:[%s3623_s28 + $0x238] sm:$0xff] %v3954_v25  ;;  %v1080_v61 = vadd.f32 1e-08, %v3954_v25  ;;  %v4063_v8 = vpop.eup %2872 }
 0x144   : > { %2573 = vst [vmem:[%s3623_s28 + $0x338] sm:$0xff] %v933_v27  ;;  %2884 = vrcp.f32 %v1079_v56  ;;  %v4068_v18 = vpop.eup %2874 }
 0x145   : > { %v3959_v28 = vpop.f32.mrb[8].mxu0  ;;  %2886 = vrcp.f32 %v1080_v61 }
 0x146   : > { %v937_v30 = vpop.f32.mrb[8].mxu1  ;;  %2542 = vst [vmem:[%s3623_s28 + $0x240] sm:$0xff] %v3959_v28  ;;  %v3964_v31 = vpop.f32.mrb[9].mxu0  ;;  %v1081_v63 = vadd.f32 1e-08, %v3959_v28 }
 0x147   : > { %2574 = vst [vmem:[%s3623_s28 + $0x340] sm:$0xff] %v937_v30  ;;  %v939_v34 = vpop.f32.mrb[9].mxu1  ;;  %2543 = vst [vmem:[%s3623_s28 + $0x248] sm:$0xff] %v3964_v31  ;;  %v1082_v19 = vadd.f32 1e-08, %v3964_v31  ;;  %v4076_v25 = vpop.eup %2876 }
 0x148   : > { %2575 = vst [vmem:[%s3623_s28 + $0x348] sm:$0xff] %v939_v34  ;;  %2888 = vrcp.f32 %v1081_v63  ;;  %v4082_v28 = vpop.eup %2878 }
 0x149   : > { %v3969_v36 = vpop.f32.mrb[10].mxu0  ;;  %2890 = vrcp.f32 %v1082_v19 }
 0x14a   : > { %v943_v37 = vpop.f32.mrb[10].mxu1  ;;  %2544 = vst [vmem:[%s3623_s28 + $0x250] sm:$0xff] %v3969_v36  ;;  %v3974_v39 = vpop.f32.mrb[11].mxu0  ;;  %v1083_v1 = vadd.f32 1e-08, %v3969_v36 }
 0x14b   : > { %2576 = vst [vmem:[%s3623_s28 + $0x350] sm:$0xff] %v943_v37  ;;  %v945_v40 = vpop.f32.mrb[11].mxu1  ;;  %2545 = vst [vmem:[%s3623_s28 + $0x258] sm:$0xff] %v3974_v39  ;;  %v1084_v23 = vadd.f32 1e-08, %v3974_v39  ;;  %v4085_v31 = vpop.eup %2880 }
 0x14c   : > { %2577 = vst [vmem:[%s3623_s28 + $0x358] sm:$0xff] %v945_v40  ;;  %2892 = vrcp.f32 %v1083_v1  ;;  %v4090_v39 = vpop.eup %2882 }
 0x14d   : > { %v3979_v41 = vpop.f32.mrb[12].mxu0  ;;  %2894 = vrcp.f32 %v1084_v23 }
 0x14e   : > { %v949_v44 = vpop.f32.mrb[12].mxu1  ;;  %2546 = vst [vmem:[%s3623_s28 + $0x260] sm:$0xff] %v3979_v41  ;;  %v3984_v45 = vpop.f32.mrb[13].mxu0  ;;  %v1085_v4 = vadd.f32 1e-08, %v3979_v41 }
 0x14f   : > { %2578 = vst [vmem:[%s3623_s28 + $0x360] sm:$0xff] %v949_v44  ;;  %v951_v47 = vpop.f32.mrb[13].mxu1  ;;  %2547 = vst [vmem:[%s3623_s28 + $0x268] sm:$0xff] %v3984_v45  ;;  %v1086_v7 = vadd.f32 1e-08, %v3984_v45  ;;  %v4098_v45 = vpop.eup %2884 }
 0x150   : > { %2579 = vst [vmem:[%s3623_s28 + $0x368] sm:$0xff] %v951_v47  ;;  %2896 = vrcp.f32 %v1085_v4 }
 0x151   : > { %v3989_v48 = vpop.f32.mrb[14].mxu0  ;;  %2898 = vrcp.f32 %v1086_v7 }
 0x152   : > { %v955_v50 = vpop.f32.mrb[14].mxu1  ;;  %2548 = vst [vmem:[%s3623_s28 + $0x270] sm:$0xff] %v3989_v48  ;;  %v3994_v51 = vpop.f32.mrb[15].mxu0  ;;  %v1087_v12 = vadd.f32 1e-08, %v3989_v48  ;;  %v326_v48 = vlaneseq }
 0x153   : > { %2580 = vst [vmem:[%s3623_s28 + $0x370] sm:$0xff] %v955_v50  ;;  %v957_v53 = vpop.f32.mrb[15].mxu1  ;;  %2549 = vst [vmem:[%s3623_s28 + $0x278] sm:$0xff] %v3994_v51  ;;  %v1088_v21 = vadd.f32 1e-08, %v3994_v51  ;;  %v4104_v50 = vpop.eup %2886 }
 0x154   : > { %2581 = vst [vmem:[%s3623_s28 + $0x378] sm:$0xff] %v957_v53  ;;  %2900 = vrcp.f32 %v1087_v12  ;;  %v4107_v53 = vpop.eup %2888  ;;  %v4133_v33 = vand.u32 127, %v326_v48 }
 0x155   : > { %v3999_v54 = vpop.f32.mrb[16].mxu0  ;;  %2902 = vrcp.f32 %v1088_v21 }
 0x156   : > { %v961_v57 = vpop.f32.mrb[16].mxu1  ;;  %2550 = vst [vmem:[%s3623_s28 + $0x280] sm:$0xff] %v3999_v54  ;;  %v4004_v58 = vpop.f32.mrb[17].mxu0  ;;  %v1089_v27 = vadd.f32 1e-08, %v3999_v54 }
 0x157   : > { %2582 = vst [vmem:[%s3623_s28 + $0x380] sm:$0xff] %v961_v57  ;;  %v963_v9 = vpop.f32.mrb[17].mxu1  ;;  %2551 = vst [vmem:[%s3623_s28 + $0x288] sm:$0xff] %v4004_v58  ;;  %v1090_v30 = vadd.f32 1e-08, %v4004_v58  ;;  %v4111_v58 = vshrl.u32 %v326_v48, 7 }
 0x158   : > { %2583 = vst [vmem:[%s3623_s28 + $0x388] sm:$0xff] %v963_v9  ;;  %2904 = vrcp.f32 %v1089_v27  ;;  %v4113_v9 = vpop.eup %2890 }
 0x159   : > { %v4009_v13 = vpop.f32.mrb[18].mxu0  ;;  %2906 = vrcp.f32 %v1090_v30  ;;  %v4131_v35 = vadd.s32 8, %v4111_v58  ;;  %v4144_v52 = vadd.s32 32, %v4111_v58  ;;  %v4147_v55 = vadd.s32 40, %v4111_v58 }
 0x15a   : > { %v967_v29 = vpop.f32.mrb[18].mxu1  ;;  %2552 = vst [vmem:[%s3623_s28 + $0x290] sm:$0xff] %v4009_v13  ;;  %v4014_v10 = vpop.f32.mrb[19].mxu0  ;;  %v1091_v34 = vadd.f32 1e-08, %v4009_v13  ;;  %v4154_v63 = vadd.s32 48, %v4111_v58  ;;  %vm398_vm1 = vcmp.eq.s32.totalorder %v4111_v58, %v4133_v33 }
 0x15b   : > { %2584 = vst [vmem:[%s3623_s28 + $0x390] sm:$0xff] %v967_v29  ;;  %v969_v32 = vpop.f32.mrb[19].mxu1  ;;  %2553 = vst [vmem:[%s3623_s28 + $0x298] sm:$0xff] %v4014_v10  ;;  %v1092_v40 = vadd.f32 1e-08, %v4014_v10  ;;  %v4120_v10 = vpop.eup %2892  ;;  %v4157_v19 = vadd.s32 56, %v4111_v58  ;;  %vm400_vm2 = vcmp.eq.s32.totalorder %v4131_v35, %v4133_v33  ;;  %vm406_vm5 = vcmp.eq.s32.totalorder %v4144_v52, %v4133_v33 }
 0x15c   : > { %2585 = vst [vmem:[%s3623_s28 + $0x398] sm:$0xff] %v969_v32  ;;  %2908 = vrcp.f32 %v1091_v34  ;;  %v4125_v32 = vpop.eup %2894  ;;  %v4167_v4 = vadd.s32 72, %v4111_v58  ;;  %v4177_v12 = vadd.s32 88, %v4111_v58  ;;  %v4190_v30 = vadd.s32 112, %v4111_v58 }
 0x15d   : > { %v4022_v38 = vpop.f32.mrb[20].mxu0  ;;  %2910 = vrcp.f32 %v1092_v40  ;;  %v4193_v34 = vadd.s32 120, %v4111_v58  ;;  %v4199_v40 = vadd.s32 136, %v4111_v58  ;;  %v4248_v14 = vadd.s32 224, %v4111_v58 }
 0x15e   : > { %v973_v42 = vpop.f32.mrb[20].mxu1  ;;  %2554 = vst [vmem:[%s3623_s28 + $0x2a0] sm:$0xff] %v4022_v38  ;;  %v4028_v46 = vpop.f32.mrb[21].mxu0  ;;  %v1093_v47 = vadd.f32 1e-08, %v4022_v38  ;;  %v4251_v11 = vadd.s32 232, %v4111_v58  ;;  %vm408_vm6 = vcmp.eq.s32.totalorder %v4147_v55, %v4133_v33  ;;  %vm410_vm7 = vcmp.eq.s32.totalorder %v4154_v63, %v4133_v33 }
 0x15f   : > { %2586 = vst [vmem:[%s3623_s28 + $0x3a0] sm:$0xff] %v973_v42  ;;  %v975_v49 = vpop.f32.mrb[21].mxu1  ;;  %2555 = vst [vmem:[%s3623_s28 + $0x2a8] sm:$0xff] %v4028_v46  ;;  %v1094_v51 = vadd.f32 1e-08, %v4028_v46  ;;  %v4135_v38 = vpop.eup %2896  ;;  %v4138_v46 = vadd.s32 16, %v4111_v58  ;;  %vm412_vm8 = vcmp.eq.s32.totalorder %v4157_v19, %v4133_v33  ;;  %vm416_vm10 = vcmp.eq.s32.totalorder %v4167_v4, %v4133_v33 }
 0x160   : > { %2587 = vst [vmem:[%s3623_s28 + $0x3a8] sm:$0xff] %v975_v49  ;;  %2912 = vrcp.f32 %v1093_v47  ;;  %v4141_v49 = vadd.s32 24, %v4111_v58  ;;  %v4149_v56 = vpop.eup %2898 }
 0x161   : > { %v4036_v59 = vpop.f32.mrb[22].mxu0  ;;  %2914 = vrcp.f32 %v1094_v51  ;;  %v4159_v1 = vpop.eup %2900  ;;  %vm402_vm3 = vcmp.eq.s32.totalorder %v4138_v46, %v4133_v33 }
 0x162   : > { %v979_v60 = vpop.f32.mrb[22].mxu1  ;;  %2556 = vst [vmem:[%s3623_s28 + $0x2b0] sm:$0xff] %v4036_v59  ;;  %v4042_v62 = vpop.f32.mrb[23].mxu0  ;;  %v4128_v20 = vadd.f32 1e-08, %v4036_v59  ;;  %vm404_vm4 = vcmp.eq.s32.totalorder %v4141_v49, %v4133_v33 }
 0x163   : > { %2588 = vst [vmem:[%s3623_s28 + $0x3b0] sm:$0xff] %v979_v60  ;;  %v981_v16 = vpop.f32.mrb[23].mxu1  ;;  %2557 = vst [vmem:[%s3623_s28 + $0x2b8] sm:$0xff] %v4042_v62  ;;  %v4169_v7 = vpop.eup %2902 }
 0x164   : > { %2589 = vst [vmem:[%s3623_s28 + $0x3b8] sm:$0xff] %v981_v16  ;;  %v4185_v21 = vpop.eup %2904  ;;  %2916 = vrcp.f32 %v4128_v20 }
 0x165   : > { %v4050_v3 = vpop.f32.mrb[24].mxu0 }
 0x166   : > { %v985_v2 = vpop.f32.mrb[24].mxu1  ;;  %2558 = vst [vmem:[%s3623_s28 + $0x2c0] sm:$0xff] %v4050_v3  ;;  %v4056_v5 = vpop.f32.mrb[25].mxu0 }
 0x167   : > { %2590 = vst [vmem:[%s3623_s28 + $0x3c0] sm:$0xff] %v985_v2  ;;  %v987_v26 = vpop.f32.mrb[25].mxu1  ;;  %2559 = vst [vmem:[%s3623_s28 + $0x2c8] sm:$0xff] %v4056_v5 }
 0x168   : > { %2591 = vst [vmem:[%s3623_s28 + $0x3c8] sm:$0xff] %v987_v26  ;;  %v4164_v26 = vadd.s32 64, %v4111_v58 }
 0x169   : > { %v4066_v15 = vpop.f32.mrb[26].mxu0 }
 0x16a   : > { %v991_v17 = vpop.f32.mrb[26].mxu1  ;;  %2560 = vst [vmem:[%s3623_s28 + $0x2d0] sm:$0xff] %v4066_v15  ;;  %v4074_v22 = vpop.f32.mrb[27].mxu0  ;;  %vm414_vm9 = vcmp.eq.s32.totalorder %v4164_v26, %v4133_v33 }
 0x16b   : > { %2592 = vst [vmem:[%s3623_s28 + $0x3d0] sm:$0xff] %v991_v17  ;;  %v993_v24 = vpop.f32.mrb[27].mxu1  ;;  %2561 = vst [vmem:[%s3623_s28 + $0x2d8] sm:$0xff] %v4074_v22  ;;  %v4180_v17 = vadd.s32 96, %v4111_v58 }
 0x16c   : > { %2593 = vst [vmem:[%s3623_s28 + $0x3d8] sm:$0xff] %v993_v24 }
 0x16d   : > { %v4088_v36 = vpop.f32.mrb[28].mxu0 }
 0x16e   : > { %4775 = vst [vmem:[#allocation15_spill] sm:$0xff] %v4088_v36  ;;  %v997_v37 = vpop.f32.mrb[28].mxu1  ;;  %2562 = vst [vmem:[%s3623_s28 + $0x2e0] sm:$0xff] %v4088_v36  ;;  %v4096_v41 = vpop.f32.mrb[29].mxu0 }
 0x16f   : > { %2594 = vst [vmem:[%s3623_s28 + $0x3e0] sm:$0xff] %v997_v37  ;;  %4776 = vst [vmem:[#allocation16_spill] sm:$0xff] %v4096_v41  ;;  %v999_v44 = vpop.f32.mrb[29].mxu1  ;;  %v4196_v37 = vadd.s32 128, %v4111_v58 }
 0x170   : > { %2563 = vst [vmem:[%s3623_s28 + $0x2e8] sm:$0xff] %v4096_v41  ;;  %2595 = vst [vmem:[%s3623_s28 + $0x3e8] sm:$0xff] %v999_v44  ;;  %v4201_v44 = vpop.eup %2906  ;;  %v4261_v41 = vadd.s32 248, %v4111_v58 }
 0x171   : > { %v4109_v54 = vpop.f32.mrb[30].mxu0 }
 0x172   : > { %4777 = vst [vmem:[#allocation17_spill] sm:$0xff] %v4109_v54  ;;  %v1003_v57 = vpop.f32.mrb[30].mxu1  ;;  %2564 = vst [vmem:[%s3623_s28 + $0x2f0] sm:$0xff] %v4109_v54  ;;  %v4118_v13 = vpop.f32.mrb[31].mxu0  ;;  %v4258_v54 = vadd.s32 240, %v4111_v58 }
 0x173   : > { %2596 = vst [vmem:[%s3623_s28 + $0x3f0] sm:$0xff] %v1003_v57  ;;  %4778 = vst [vmem:[#allocation18_spill] sm:$0xff] %v4118_v13  ;;  %v1005_v29 = vpop.f32.mrb[31].mxu1 }
 0x174   : > { %2565 = vst [vmem:[%s3623_s28 + $0x2f8] sm:$0xff] %v4118_v13  ;;  %2597 = vst [vmem:[%s3623_s28 + $0x3f8] sm:$0xff] %v1005_v29  ;;  %v4206_v29 = vadd.s32 144, %v4111_v58 }
 0x175   : > { %v1983_v43 = vpop.f32.mrb[32].mxu0 }
 0x176   : > { %v1464_v42 = vpop.f32.mrb[32].mxu1  ;;  %v2174_v60 = vmul.f32 %v4063_v8, %v1983_v43  ;;  %v1985_v16 = vpop.f32.mrb[33].mxu0 }
 0x177   : > { %v1655_v59 = vmul.f32 %v4063_v8, %v1464_v42  ;;  %v1466_v61 = vpop.f32.mrb[33].mxu1  ;;  %v2175_v23 = vmul.f32 %v4068_v18, %v1985_v16  ;;  %v4174_v8 = vadd.s32 80, %v4111_v58  ;;  %v4209_v42 = vadd.s32 152, %v4111_v58  ;;  %v4211_v43 = vpop.eup %2908 }
 0x178   : > { %v1656_v2 = vmul.f32 %v4068_v18, %v1466_v61  ;;  %2728 = vst [vmem:[%s3623_s28 + $0x600] sm:$0xff] %v2174_v60  ;;  %v4183_v18 = vadd.s32 104, %v4111_v58  ;;  %v4216_v61 = vadd.s32 160, %v4111_v58  ;;  %v4221_v16 = vpop.eup %2910 }
 0x179   : > { %2631 = vst [vmem:[%s3623_s28 + $0x400] sm:$0xff] %v1655_v59  ;;  %2729 = vst [vmem:[%s3623_s28 + $0x608] sm:$0xff] %v2175_v23  ;;  %v1989_v27 = vpop.f32.mrb[34].mxu0  ;;  %v4229_v23 = vadd.s32 184, %v4111_v58 }
 0x17a   : > { %2632 = vst [vmem:[%s3623_s28 + $0x408] sm:$0xff] %v1656_v2  ;;  %v1470_v24 = vpop.f32.mrb[34].mxu1  ;;  %v2176_v48 = vmul.f32 %v4076_v25, %v1989_v27  ;;  %v1991_v57 = vpop.f32.mrb[35].mxu0  ;;  %v4226_v2 = vadd.s32 176, %v4111_v58 }
 0x17b   : > { %v1657_v47 = vmul.f32 %v4076_v25, %v1470_v24  ;;  %v1472_v51 = vpop.f32.mrb[35].mxu1  ;;  %v2177_v60 = vmul.f32 %v4082_v28, %v1991_v57  ;;  %v4219_v25 = vadd.s32 168, %v4111_v58  ;;  %v4232_v24 = vadd.s32 192, %v4111_v58  ;;  %v4237_v27 = vpop.eup %2912 }
 0x17c   : > { %v1658_v59 = vmul.f32 %v4082_v28, %v1472_v51  ;;  %2730 = vst [vmem:[%s3623_s28 + $0x610] sm:$0xff] %v2176_v48  ;;  %v4235_v28 = vadd.s32 200, %v4111_v58  ;;  %4779 = vst [vmem:[#allocation19_spill] sm:$0xff] %v4237_v27  ;;  %v4245_v48 = vadd.s32 216, %v4111_v58  ;;  %v4253_v0 = vpop.eup %2914 }
 0x17d   : > { %2633 = vst [vmem:[%s3623_s28 + $0x410] sm:$0xff] %v1657_v47  ;;  %2731 = vst [vmem:[%s3623_s28 + $0x618] sm:$0xff] %v2177_v60  ;;  %v1995_v57 = vpop.f32.mrb[36].mxu0  ;;  %v4242_v47 = vadd.s32 208, %v4111_v58 }
 0x17e   : > { %2634 = vst [vmem:[%s3623_s28 + $0x418] sm:$0xff] %v1658_v59  ;;  %v1476_v51 = vpop.f32.mrb[36].mxu1  ;;  %4780 = vst [vmem:[#allocation20_spill] sm:$0xff] %v4253_v0  ;;  %v2178_v60 = vmul.f32 %v4085_v31, %v1995_v57  ;;  %v1997_v13 = vpop.f32.mrb[37].mxu0  ;;  %v4266_v0 = vadd.s32 128, %v4133_v33 }
 0x17f   : > { %v1659_v59 = vmul.f32 %v4085_v31, %v1476_v51  ;;  %v1478_v6 = vpop.f32.mrb[37].mxu1  ;;  %v2179_v27 = vmul.f32 %v4090_v39, %v1997_v13 }
 0x180   : > { %v1660_v36 = vmul.f32 %v4090_v39, %v1478_v6  ;;  %2732 = vst [vmem:[%s3623_s28 + $0x620] sm:$0xff] %v2178_v60  ;;  %vm445_vm0 = vcmp.eq.s32.totalorder %v4229_v23, %v4266_v0  ;;  %vm453_vm14 = vcmp.eq.s32.totalorder %v4245_v48, %v4266_v0  ;;  %vm455_vm12 = vcmp.eq.s32.totalorder %v4248_v14, %v4266_v0 }
 0x181   : > { %2635 = vst [vmem:[%s3623_s28 + $0x420] sm:$0xff] %v1659_v59  ;;  %2733 = vst [vmem:[%s3623_s28 + $0x628] sm:$0xff] %v2179_v27  ;;  %v2001_v31 = vpop.f32.mrb[38].mxu0  ;;  %vm457_vm15 = vcmp.eq.s32.totalorder %v4251_v11, %v4266_v0  ;;  %vm459_vm11 = vcmp.eq.s32.totalorder %v4258_v54, %v4266_v0  ;;  %vm461_vm13 = vcmp.eq.s32.totalorder %v4261_v41, %v4266_v0  ;;  %v1097_v41 = vadd.f32 1e-08, %v4050_v3 }
 0x182   : > { %2636 = vst [vmem:[%s3623_s28 + $0x428] sm:$0xff] %v1660_v36  ;;  %v1482_v6 = vpop.f32.mrb[38].mxu1  ;;  %v2180_v36 = vmul.f32 %v4098_v45, %v2001_v31  ;;  %v2003_v27 = vpop.f32.mrb[39].mxu0 }
 0x183   : > { %v1661_v39 = vmul.f32 %v4098_v45, %v1482_v6  ;;  %v1484_v13 = vpop.f32.mrb[39].mxu1  ;;  %v2181_v57 = vmul.f32 %v4104_v50, %v2003_v27 }
 0x184   : > { %v1662_v51 = vmul.f32 %v4104_v50, %v1484_v13  ;;  %2734 = vst [vmem:[%s3623_s28 + $0x630] sm:$0xff] %v2180_v36  ;;  %v4353_v13 = vld [vmem:[%s3623_s28 + $0x8] sm:$0xff] }
 0x185   : > { %2637 = vst [vmem:[%s3623_s28 + $0x430] sm:$0xff] %v1661_v39  ;;  %2735 = vst [vmem:[%s3623_s28 + $0x638] sm:$0xff] %v2181_v57  ;;  %v2007_v50 = vpop.f32.mrb[40].mxu0  ;;  %v2470_v27 = vsel %vm398_vm1, 1.0, %v4353_v13  ;;  %v2472_v58 = vsel %vm402_vm3, 1.0, %v4353_v13  ;;  %v2473_v35 = vsel %vm404_vm4, 1.0, %v4353_v13  ;;  %vm4781_vm1 = vcmp.eq.s32.totalorder %v4174_v8, %v4133_v33 }
 0x186   : > { %2638 = vst [vmem:[%s3623_s28 + $0x438] sm:$0xff] %v1662_v51  ;;  %v1488_v45 = vpop.f32.mrb[40].mxu1  ;;  %v2182_v60 = vmul.f32 %v4107_v53, %v2007_v50  ;;  %v2009_v31 = vpop.f32.mrb[41].mxu0  ;;  %590 = vst [vmem:[%s3623_s28] sm:$0xff] %v2470_v27  ;;  %v2476_v46 = vsel %vm410_vm7, 1.0, %v4353_v13  ;;  %v2477_v49 = vsel %vm412_vm8, 1.0, %v4353_v13  ;;  %v2478_v52 = vsel %vm414_vm9, 1.0, %v4353_v13 }
 0x187   : > { %v1663_v59 = vmul.f32 %v4107_v53, %v1488_v45  ;;  %v1490_v6 = vpop.f32.mrb[41].mxu1  ;;  %v2183_v36 = vmul.f32 %v4113_v9, %v2009_v31  ;;  %594 = vst [vmem:[%s3623_s28 + $0x20] sm:$0xff] %v2472_v58  ;;  %596 = vst [vmem:[%s3623_s28 + $0x30] sm:$0xff] %v2473_v35  ;;  %v2479_v19 = vsel %vm416_vm10, 1.0, %v4353_v13  ;;  %v2480_v26 = vsel %vm4781_vm1, 1.0, %v4353_v13 }
 0x188   : > { %v1664_v39 = vmul.f32 %v4113_v9, %v1490_v6  ;;  %2736 = vst [vmem:[%s3623_s28 + $0x640] sm:$0xff] %v2182_v60  ;;  %v2474_v6 = vsel %vm406_vm5, 1.0, %v4353_v13  ;;  %vm4783_vm3 = vcmp.eq.s32.totalorder %v4180_v17, %v4133_v33  ;;  %602 = vst [vmem:[%s3623_s28 + $0x60] sm:$0xff] %v2476_v46  ;;  %vm4784_vm4 = vcmp.eq.s32.totalorder %v4183_v18, %v4133_v33 }
 0x189   : > { %2639 = vst [vmem:[%s3623_s28 + $0x440] sm:$0xff] %v1663_v59  ;;  %2737 = vst [vmem:[%s3623_s28 + $0x648] sm:$0xff] %v2183_v36  ;;  %v2013_v9 = vpop.f32.mrb[42].mxu0  ;;  %v2471_v59 = vsel %vm400_vm2, 1.0, %v4353_v13  ;;  %vm4782_vm2 = vcmp.eq.s32.totalorder %v4177_v12, %v4133_v33  ;;  %v2483_v17 = vsel %vm4784_vm4, 1.0, %v4353_v13  ;;  %vm4785_vm5 = vcmp.eq.s32.totalorder %v4190_v30, %v4133_v33 }
 0x18a   : > { %2640 = vst [vmem:[%s3623_s28 + $0x448] sm:$0xff] %v1664_v39  ;;  %v1494_v53 = vpop.f32.mrb[42].mxu1  ;;  %v2184_v57 = vmul.f32 %v4120_v10, %v2013_v9  ;;  %v2015_v50 = vpop.f32.mrb[43].mxu0  ;;  %592 = vst [vmem:[%s3623_s28 + $0x10] sm:$0xff] %v2471_v59  ;;  %v2481_v31 = vsel %vm4782_vm2, 1.0, %v4353_v13  ;;  %v2482_v39 = vsel %vm4783_vm3, 1.0, %v4353_v13  ;;  %vm4787_vm7 = vcmp.eq.s32.totalorder %v4196_v37, %v4266_v0 }
 0x18b   : > { %v1665_v51 = vmul.f32 %v4120_v10, %v1494_v53  ;;  %v1496_v45 = vpop.f32.mrb[43].mxu1  ;;  %v2185_v10 = vmul.f32 %v4125_v32, %v2015_v50  ;;  %598 = vst [vmem:[%s3623_s28 + $0x40] sm:$0xff] %v2474_v6  ;;  %604 = vst [vmem:[%s3623_s28 + $0x70] sm:$0xff] %v2477_v49  ;;  %v2484_v53 = vsel %vm4785_vm5, 1.0, %v4353_v13  ;;  %v2486_v30 = vsel %vm4787_vm7, 1.0, %v4353_v13 }
 0x18c   : > { %v1666_v60 = vmul.f32 %v4125_v32, %v1496_v45  ;;  %2738 = vst [vmem:[%s3623_s28 + $0x650] sm:$0xff] %v2184_v57  ;;  %v2475_v32 = vsel %vm408_vm6, 1.0, %v4353_v13  ;;  %606 = vst [vmem:[%s3623_s28 + $0x80] sm:$0xff] %v2478_v52  ;;  %vm4786_vm6 = vcmp.eq.s32.totalorder %v4193_v34, %v4133_v33  ;;  %vm4788_vm8 = vcmp.eq.s32.totalorder %v4199_v40, %v4266_v0 }
 0x18d   : > { %2641 = vst [vmem:[%s3623_s28 + $0x450] sm:$0xff] %v1665_v51  ;;  %2739 = vst [vmem:[%s3623_s28 + $0x658] sm:$0xff] %v2185_v10  ;;  %v2019_v63 = vpop.f32.mrb[44].mxu0  ;;  %v2485_v18 = vsel %vm4786_vm6, 1.0, %v4353_v13  ;;  %vm4789_vm9 = vcmp.eq.s32.totalorder %v4206_v29, %v4266_v0  ;;  %vm4790_vm10 = vcmp.eq.s32.totalorder %v4209_v42, %v4266_v0  ;;  %vm4791_vm1 = vcmp.eq.s32.totalorder %v4216_v61, %v4266_v0 }
 0x18e   : > { %2642 = vst [vmem:[%s3623_s28 + $0x458] sm:$0xff] %v1666_v60  ;;  %v1500_v55 = vpop.f32.mrb[44].mxu1  ;;  %600 = vst [vmem:[%s3623_s28 + $0x50] sm:$0xff] %v2475_v32  ;;  %v2186_v8 = vmul.f32 %v4135_v38, %v2019_v63  ;;  %v2021_v36 = vpop.f32.mrb[45].mxu0  ;;  %v2488_v33 = vsel %vm4789_vm9, 1.0, %v4353_v13  ;;  %v2489_v34 = vsel %vm4790_vm10, 1.0, %v4353_v13  ;;  %vm4792_vm2 = vcmp.eq.s32.totalorder %v4219_v25, %v4266_v0 }
 0x18f   : > { %v1667_v4 = vmul.f32 %v4135_v38, %v1500_v55  ;;  %v1502_v12 = vpop.f32.mrb[45].mxu1  ;;  %608 = vst [vmem:[%s3623_s28 + $0x90] sm:$0xff] %v2479_v19  ;;  %610 = vst [vmem:[%s3623_s28 + $0xa0] sm:$0xff] %v2480_v26  ;;  %v2187_v9 = vmul.f32 %v4149_v56, %v2021_v36  ;;  %v2490_v37 = vsel %vm4791_vm1, 1.0, %v4353_v13  ;;  %v2491_v42 = vsel %vm4792_vm2, 1.0, %v4353_v13  ;;  %v4797_v63 = vld [vmem:[#allocation19_spill] sm:$0xff] }
 0x190   : > { %612 = vst [vmem:[%s3623_s28 + $0xb0] sm:$0xff] %v2481_v31  ;;  %614 = vst [vmem:[%s3623_s28 + $0xc0] sm:$0xff] %v2482_v39  ;;  %v1668_v38 = vmul.f32 %v4149_v56, %v1502_v12  ;;  %v2487_v56 = vsel %vm4788_vm8, 1.0, %v4353_v13  ;;  %vm4793_vm3 = vcmp.eq.s32.totalorder %v4226_v2, %v4266_v0  ;;  %v2493_v27 = vsel %vm445_vm0, 1.0, %v4353_v13  ;;  %v4800_v12 = vld [vmem:[#allocation16_spill] sm:$0xff] }
 0x191   : > { %616 = vst [vmem:[%s3623_s28 + $0xd0] sm:$0xff] %v2483_v17  ;;  %618 = vst [vmem:[%s3623_s28 + $0xe0] sm:$0xff] %v2484_v53  ;;  %v2025_v29 = vpop.f32.mrb[46].mxu0  ;;  %v2492_v61 = vsel %vm4793_vm3, 1.0, %v4353_v13  ;;  %vm4794_vm4 = vcmp.eq.s32.totalorder %v4232_v24, %v4266_v0  ;;  %vm4795_vm0 = vcmp.eq.s32.totalorder %v4235_v28, %v4266_v0  ;;  %vm4796_vm5 = vcmp.eq.s32.totalorder %v4242_v47, %v4266_v0  ;;  %v2917_v17 = vpop.eup %2916 }
 0x192   : > { %2643 = vst [vmem:[%s3623_s28 + $0x460] sm:$0xff] %v1667_v4  ;;  %2740 = vst [vmem:[%s3623_s28 + $0x660] sm:$0xff] %v2186_v8  ;;  %v1506_v40 = vpop.f32.mrb[46].mxu1  ;;  %v2494_v51 = vsel %vm4794_vm4, 1.0, %v4353_v13  ;;  %v2188_v2 = vmul.f32 %v4159_v1, %v2025_v29  ;;  %v2027_v23 = vpop.f32.mrb[47].mxu0  ;;  %v2495_v24 = vsel %vm4795_vm0, 1.0, %v4353_v13 }
 0x193   : > { %620 = vst [vmem:[%s3623_s28 + $0xf0] sm:$0xff] %v2485_v18  ;;  %623 = vst [vmem:[%s3623_s28 + $0x108] sm:$0xff] %v2486_v30  ;;  %v1669_v25 = vmul.f32 %v4159_v1, %v1506_v40  ;;  %v1508_v57 = vpop.f32.mrb[47].mxu1  ;;  %v2496_v45 = vsel %vm4796_vm5, 1.0, %v4353_v13  ;;  %v2189_v50 = vmul.f32 %v4169_v7, %v2027_v23  ;;  %v2497_v28 = vsel %vm453_vm14, 1.0, %v4353_v13 }
 0x194   : > { %2644 = vst [vmem:[%s3623_s28 + $0x468] sm:$0xff] %v1668_v38  ;;  %2741 = vst [vmem:[%s3623_s28 + $0x668] sm:$0xff] %v2187_v9  ;;  %v1670_v1 = vmul.f32 %v4169_v7, %v1508_v57  ;;  %v2498_v47 = vsel %vm455_vm12, 1.0, %v4353_v13  ;;  %v1096_v59 = vadd.f32 1e-08, %v4042_v62  ;;  %v2499_v7 = vsel %vm457_vm15, 1.0, %v4353_v13 }
 0x195   : > { %625 = vst [vmem:[%s3623_s28 + $0x118] sm:$0xff] %v2487_v56  ;;  %627 = vst [vmem:[%s3623_s28 + $0x128] sm:$0xff] %v2488_v33  ;;  %v2500_v14 = vsel %vm459_vm11, 1.0, %v4353_v13  ;;  %v2501_v48 = vsel %vm461_vm13, 1.0, %v4353_v13  ;;  %v2031_v58 = vpop.f32.mrb[48].mxu0 }
 0x196   : > { %629 = vst [vmem:[%s3623_s28 + $0x138] sm:$0xff] %v2489_v34  ;;  %631 = vst [vmem:[%s3623_s28 + $0x148] sm:$0xff] %v2490_v37  ;;  %v1512_v62 = vpop.f32.mrb[48].mxu1  ;;  %v2190_v54 = vmul.f32 %v4185_v21, %v2031_v58  ;;  %v2033_v0 = vpop.f32.mrb[49].mxu0  ;;  %2918 = vrcp.f32 %v1096_v59  ;;  %v1098_v35 = vadd.f32 1e-08, %v4056_v5 }
 0x197   : > { %633 = vst [vmem:[%s3623_s28 + $0x158] sm:$0xff] %v2491_v42  ;;  %635 = vst [vmem:[%s3623_s28 + $0x168] sm:$0xff] %v2492_v61  ;;  %v1671_v11 = vmul.f32 %v4185_v21, %v1512_v62  ;;  %v1514_v60 = vpop.f32.mrb[49].mxu1  ;;  %v2191_v10 = vmul.f32 %v4201_v44, %v2033_v0  ;;  %2920 = vrcp.f32 %v1097_v41  ;;  %v1100_v52 = vadd.f32 1e-08, %v4074_v22  ;;  %v4799_v22 = vld [vmem:[#allocation20_spill] sm:$0xff] }
 0x198   : > { %637 = vst [vmem:[%s3623_s28 + $0x178] sm:$0xff] %v2493_v27  ;;  %639 = vst [vmem:[%s3623_s28 + $0x188] sm:$0xff] %v2494_v51  ;;  %v1672_v13 = vmul.f32 %v4201_v44, %v1514_v60  ;;  %v1099_v44 = vadd.f32 1e-08, %v4066_v15  ;;  %2922 = vrcp.f32 %v1098_v35  ;;  %v1102_v36 = vadd.f32 1e-08, %v4800_v12 }
 0x199   : > { %641 = vst [vmem:[%s3623_s28 + $0x198] sm:$0xff] %v2495_v24  ;;  %643 = vst [vmem:[%s3623_s28 + $0x1a8] sm:$0xff] %v2496_v45  ;;  %v2037_v6 = vpop.f32.mrb[50].mxu0  ;;  %v4801_v34 = vld [vmem:[#allocation17_spill] sm:$0xff]  ;;  %v4802_v42 = vld [vmem:[#allocation18_spill] sm:$0xff] }
 0x19a   : > { %2645 = vst [vmem:[%s3623_s28 + $0x470] sm:$0xff] %v1669_v25  ;;  %2742 = vst [vmem:[%s3623_s28 + $0x670] sm:$0xff] %v2188_v2  ;;  %v1518_v21 = vpop.f32.mrb[50].mxu1  ;;  %v2192_v3 = vmul.f32 %v4211_v43, %v2037_v6  ;;  %v2039_v46 = vpop.f32.mrb[51].mxu0  ;;  %2924 = vrcp.f32 %v1099_v44  ;;  %v1103_v37 = vadd.f32 1e-08, %v4801_v34 }
 0x19b   : > { %645 = vst [vmem:[%s3623_s28 + $0x1b8] sm:$0xff] %v2497_v28  ;;  %647 = vst [vmem:[%s3623_s28 + $0x1c8] sm:$0xff] %v2498_v47  ;;  %v1673_v20 = vmul.f32 %v4211_v43, %v1518_v21  ;;  %v1520_v32 = vpop.f32.mrb[51].mxu1  ;;  %v2193_v49 = vmul.f32 %v4221_v16, %v2039_v46  ;;  %2926 = vrcp.f32 %v1100_v52  ;;  %v1104_v61 = vadd.f32 1e-08, %v4802_v42  ;;  %v4804_v59 = vld [vmem:[#allocation12_spill] sm:$0xff] }
 0x19c   : > { %2646 = vst [vmem:[%s3623_s28 + $0x478] sm:$0xff] %v1670_v1  ;;  %2743 = vst [vmem:[%s3623_s28 + $0x678] sm:$0xff] %v2189_v50  ;;  %v1674_v5 = vmul.f32 %v4221_v16, %v1520_v32  ;;  %v4798_v16 = vld [vmem:[#allocation15_spill] sm:$0xff]  ;;  %v4805_v41 = vld [vmem:[#allocation13_spill] sm:$0xff] }
 0x19d   : > { %649 = vst [vmem:[%s3623_s28 + $0x1d8] sm:$0xff] %v2499_v7  ;;  %651 = vst [vmem:[%s3623_s28 + $0x1e8] sm:$0xff] %v2500_v14  ;;  %v2043_v55 = vpop.f32.mrb[52].mxu0  ;;  %v1101_v39 = vadd.f32 1e-08, %v4798_v16  ;;  %v4803_v1 = vld [vmem:[#allocation11_spill] sm:$0xff] }
 0x19e   : > { %653 = vst [vmem:[%s3623_s28 + $0x1f8] sm:$0xff] %v2501_v48  ;;  %2647 = vst [vmem:[%s3623_s28 + $0x480] sm:$0xff] %v1671_v11  ;;  %v1524_v43 = vpop.f32.mrb[52].mxu1  ;;  %v2194_v15 = vmul.f32 %v4797_v63, %v2043_v55  ;;  %v2045_v31 = vpop.f32.mrb[53].mxu0  ;;  %v1105_v50 = vadd.f32 1e-08, %v4803_v1 }
 0x19f   : > { %2744 = vst [vmem:[%s3623_s28 + $0x680] sm:$0xff] %v2190_v54  ;;  %2648 = vst [vmem:[%s3623_s28 + $0x488] sm:$0xff] %v1672_v13  ;;  %v1675_v19 = vmul.f32 %v4797_v63, %v1524_v43  ;;  %v1526_v26 = vpop.f32.mrb[53].mxu1  ;;  %v2195_v8 = vmul.f32 %v4799_v22, %v2045_v31  ;;  %2928 = vrcp.f32 %v1101_v39  ;;  %v1106_v7 = vadd.f32 1e-08, %v4804_v59  ;;  %v4806_v21 = vld [vmem:[#allocation14_spill] sm:$0xff] }
 0x1a0   : > { %2745 = vst [vmem:[%s3623_s28 + $0x688] sm:$0xff] %v2191_v10  ;;  %2649 = vst [vmem:[%s3623_s28 + $0x490] sm:$0xff] %v1673_v20  ;;  %v1676_v4 = vmul.f32 %v4799_v22, %v1526_v26  ;;  %v2919_v9 = vpop.eup %2918  ;;  %2930 = vrcp.f32 %v1102_v36  ;;  %v1107_v13 = vadd.f32 1e-08, %v4805_v41  ;;  %v1108_v6 = vadd.f32 1e-08, %v4806_v21 }
 0x1a1   : > { %2746 = vst [vmem:[%s3623_s28 + $0x690] sm:$0xff] %v2192_v3  ;;  %2650 = vst [vmem:[%s3623_s28 + $0x498] sm:$0xff] %v1674_v5  ;;  %v2049_v38 = vpop.f32.mrb[54].mxu0  ;;  %v2921_v27 = vpop.eup %2920  ;;  %2932 = vrcp.f32 %v1103_v37  ;;  %v3001_v43 = vld [vmem:[%s3623_s28 + $0x320] sm:$0xff] }
 0x1a2   : > { %2747 = vst [vmem:[%s3623_s28 + $0x698] sm:$0xff] %v2193_v49  ;;  %2651 = vst [vmem:[%s3623_s28 + $0x4a0] sm:$0xff] %v1675_v19  ;;  %v1530_v53 = vpop.f32.mrb[54].mxu1  ;;  %v2196_v30 = vmul.f32 %v2917_v17, %v2049_v38  ;;  %v2051_v33 = vpop.f32.mrb[55].mxu0  ;;  %2934 = vrcp.f32 %v1104_v61  ;;  %v1109_v55 = vadd.f32 1e-08, %v3001_v43 }
 0x1a3   : > { %2748 = vst [vmem:[%s3623_s28 + $0x6a0] sm:$0xff] %v2194_v15  ;;  %2652 = vst [vmem:[%s3623_s28 + $0x4a8] sm:$0xff] %v1676_v4  ;;  %v1677_v18 = vmul.f32 %v2917_v17, %v1530_v53  ;;  %v1532_v56 = vpop.f32.mrb[55].mxu1  ;;  %v2197_v29 = vmul.f32 %v2919_v9, %v2051_v33  ;;  %v2923_v2 = vpop.eup %2922  ;;  %2936 = vrcp.f32 %v1105_v50  ;;  %v3002_v15 = vld [vmem:[%s3623_s28 + $0x328] sm:$0xff]  ;;  %v3003_v17 = vld [vmem:[%s3623_s28 + $0x330] sm:$0xff] }
 0x1a4   : > { %2749 = vst [vmem:[%s3623_s28 + $0x6a8] sm:$0xff] %v2195_v8  ;;  %v1678_v40 = vmul.f32 %v2919_v9, %v1532_v56  ;;  %2750 = vst [vmem:[%s3623_s28 + $0x6b0] sm:$0xff] %v2196_v30  ;;  %v2925_v14 = vpop.eup %2924  ;;  %2938 = vrcp.f32 %v1106_v7  ;;  %v1110_v26 = vadd.f32 1e-08, %v3002_v15  ;;  %v1111_v53 = vadd.f32 1e-08, %v3003_v17 }
 0x1a5   : > { %2653 = vst [vmem:[%s3623_s28 + $0x4b0] sm:$0xff] %v1677_v18  ;;  %2751 = vst [vmem:[%s3623_s28 + $0x6b8] sm:$0xff] %v2197_v29  ;;  %v2055_v25 = vpop.f32.mrb[56].mxu0  ;;  %v2927_v58 = vpop.eup %2926  ;;  %2940 = vrcp.f32 %v1107_v13  ;;  %v3004_v18 = vld [vmem:[%s3623_s28 + $0x338] sm:$0xff] }
 0x1a6   : > { %2654 = vst [vmem:[%s3623_s28 + $0x4b8] sm:$0xff] %v1678_v40  ;;  %v1536_v51 = vpop.f32.mrb[56].mxu1  ;;  %v2198_v23 = vmul.f32 %v2921_v27, %v2055_v25  ;;  %v2057_v45 = vpop.f32.mrb[57].mxu0  ;;  %2942 = vrcp.f32 %v1108_v6  ;;  %v1112_v30 = vadd.f32 1e-08, %v3004_v18 }
 0x1a7   : > { %v1679_v57 = vmul.f32 %v2921_v27, %v1536_v51  ;;  %v1538_v24 = vpop.f32.mrb[57].mxu1  ;;  %v2199_v47 = vmul.f32 %v2923_v2, %v2057_v45  ;;  %2944 = vrcp.f32 %v1109_v55  ;;  %v3005_v27 = vld [vmem:[%s3623_s28 + $0x340] sm:$0xff] }
 0x1a8   : > { %v1680_v28 = vmul.f32 %v2923_v2, %v1538_v24  ;;  %2752 = vst [vmem:[%s3623_s28 + $0x6c0] sm:$0xff] %v2198_v23  ;;  %2946 = vrcp.f32 %v1110_v26  ;;  %v1113_v51 = vadd.f32 1e-08, %v3005_v27 }
 0x1a9   : > { %2655 = vst [vmem:[%s3623_s28 + $0x4c0] sm:$0xff] %v1679_v57  ;;  %2753 = vst [vmem:[%s3623_s28 + $0x6c8] sm:$0xff] %v2199_v47  ;;  %v2061_v62 = vpop.f32.mrb[58].mxu0  ;;  %v2929_v20 = vpop.eup %2928  ;;  %2948 = vrcp.f32 %v1111_v53  ;;  %v3006_v57 = vld [vmem:[%s3623_s28 + $0x348] sm:$0xff] }
 0x1aa   : > { %2656 = vst [vmem:[%s3623_s28 + $0x4c8] sm:$0xff] %v1680_v28  ;;  %v1542_v48 = vpop.f32.mrb[58].mxu1  ;;  %v2200_v54 = vmul.f32 %v2925_v14, %v2061_v62  ;;  %v2063_v0 = vpop.f32.mrb[59].mxu0  ;;  %2950 = vrcp.f32 %v1112_v30  ;;  %v1114_v23 = vadd.f32 1e-08, %v3006_v57 }
 0x1ab   : > { %v1681_v11 = vmul.f32 %v2925_v14, %v1542_v48  ;;  %v1544_v60 = vpop.f32.mrb[59].mxu1  ;;  %v2201_v35 = vmul.f32 %v2927_v58, %v2063_v0  ;;  %v2931_v46 = vpop.eup %2930  ;;  %2952 = vrcp.f32 %v1113_v51  ;;  %v3007_v14 = vld [vmem:[%s3623_s28 + $0x350] sm:$0xff] }
 0x1ac   : > { %v1682_v10 = vmul.f32 %v2927_v58, %v1544_v60  ;;  %2754 = vst [vmem:[%s3623_s28 + $0x6d0] sm:$0xff] %v2200_v54  ;;  %v2933_v31 = vpop.eup %2932  ;;  %v1115_v48 = vadd.f32 1e-08, %v3007_v14  ;;  %2954 = vrcp.f32 %v1114_v23 }
 0x1ad   : > { %2657 = vst [vmem:[%s3623_s28 + $0x4d0] sm:$0xff] %v1681_v11  ;;  %2755 = vst [vmem:[%s3623_s28 + $0x6d8] sm:$0xff] %v2201_v35  ;;  %v2067_v32 = vpop.f32.mrb[60].mxu0  ;;  %v2935_v22 = vpop.eup %2934  ;;  %v3008_v11 = vld [vmem:[%s3623_s28 + $0x358] sm:$0xff] }
 0x1ae   : > { %2658 = vst [vmem:[%s3623_s28 + $0x4d8] sm:$0xff] %v1682_v10  ;;  %v1548_v3 = vpop.f32.mrb[60].mxu1  ;;  %v2202_v5 = vmul.f32 %v2929_v20, %v2067_v32  ;;  %v2069_v52 = vpop.f32.mrb[61].mxu0  ;;  %v1116_v54 = vadd.f32 1e-08, %v3008_v11  ;;  %2956 = vrcp.f32 %v1115_v48 }
 0x1af   : > { %v1683_v44 = vmul.f32 %v2929_v20, %v1548_v3  ;;  %v1550_v49 = vpop.f32.mrb[61].mxu1  ;;  %v2203_v19 = vmul.f32 %v2931_v46, %v2069_v52  ;;  %v2937_v56 = vpop.eup %2936  ;;  %v3009_v20 = vld [vmem:[%s3623_s28 + $0x360] sm:$0xff] }
 0x1b0   : > { %v1684_v63 = vmul.f32 %v2931_v46, %v1550_v49  ;;  %2756 = vst [vmem:[%s3623_s28 + $0x6e0] sm:$0xff] %v2202_v5  ;;  %v2939_v37 = vpop.eup %2938  ;;  %v1117_v3 = vadd.f32 1e-08, %v3009_v20  ;;  %2958 = vrcp.f32 %v1116_v54 }
 0x1b1   : > { %2659 = vst [vmem:[%s3623_s28 + $0x4e0] sm:$0xff] %v1683_v44  ;;  %2757 = vst [vmem:[%s3623_s28 + $0x6e8] sm:$0xff] %v2203_v19  ;;  %v2073_v39 = vpop.f32.mrb[62].mxu0  ;;  %v2941_v24 = vpop.eup %2940  ;;  %v3010_v44 = vld [vmem:[%s3623_s28 + $0x368] sm:$0xff] }
 0x1b2   : > { %2660 = vst [vmem:[%s3623_s28 + $0x4e8] sm:$0xff] %v1684_v63  ;;  %v1554_v16 = vpop.f32.mrb[62].mxu1  ;;  %v2204_v8 = vmul.f32 %v2933_v31, %v2073_v39  ;;  %v2075_v36 = vpop.f32.mrb[63].mxu0  ;;  %v1118_v5 = vadd.f32 1e-08, %v3010_v44  ;;  %2960 = vrcp.f32 %v1117_v3 }
 0x1b3   : > { %v1685_v4 = vmul.f32 %v2933_v31, %v1554_v16  ;;  %v1556_v12 = vpop.f32.mrb[63].mxu1  ;;  %v2205_v9 = vmul.f32 %v2935_v22, %v2075_v36  ;;  %v2943_v50 = vpop.eup %2942  ;;  %v3011_v31 = vld [vmem:[%s3623_s28 + $0x370] sm:$0xff] }
 0x1b4   : > { %v1686_v38 = vmul.f32 %v2935_v22, %v1556_v12  ;;  %2758 = vst [vmem:[%s3623_s28 + $0x6f0] sm:$0xff] %v2204_v8  ;;  %v2945_v60 = vpop.eup %2944  ;;  %v1119_v16 = vadd.f32 1e-08, %v3011_v31  ;;  %2962 = vrcp.f32 %v1118_v5 }
 0x1b5   : > { %2661 = vst [vmem:[%s3623_s28 + $0x4f0] sm:$0xff] %v1685_v4  ;;  %2759 = vst [vmem:[%s3623_s28 + $0x6f8] sm:$0xff] %v2205_v9  ;;  %v2079_v34 = vpop.f32.mrb[64].mxu0  ;;  %v2947_v13 = vpop.eup %2946  ;;  %v3012_v4 = vld [vmem:[%s3623_s28 + $0x378] sm:$0xff] }
 0x1b6   : > { %2662 = vst [vmem:[%s3623_s28 + $0x4f8] sm:$0xff] %v1686_v38  ;;  %v1560_v33 = vpop.f32.mrb[64].mxu1  ;;  %v2206_v29 = vmul.f32 %v2937_v56, %v2079_v34  ;;  %v2081_v61 = vpop.f32.mrb[65].mxu0  ;;  %v1120_v8 = vadd.f32 1e-08, %v3012_v4  ;;  %2964 = vrcp.f32 %v1119_v16 }
 0x1b7   : > { %v1687_v40 = vmul.f32 %v2937_v56, %v1560_v33  ;;  %v1562_v42 = vpop.f32.mrb[65].mxu1  ;;  %v2207_v2 = vmul.f32 %v2939_v37, %v2081_v61  ;;  %v2949_v49 = vpop.eup %2948  ;;  %v3013_v56 = vld [vmem:[%s3623_s28 + $0x380] sm:$0xff] }
 0x1b8   : > { %v1688_v25 = vmul.f32 %v2939_v37, %v1562_v42  ;;  %2760 = vst [vmem:[%s3623_s28 + $0x700] sm:$0xff] %v2206_v29  ;;  %v2951_v55 = vpop.eup %2950  ;;  %v1121_v33 = vadd.f32 1e-08, %v3013_v56  ;;  %2966 = vrcp.f32 %v1120_v8 }
 0x1b9   : > { %2663 = vst [vmem:[%s3623_s28 + $0x500] sm:$0xff] %v1687_v40  ;;  %2761 = vst [vmem:[%s3623_s28 + $0x708] sm:$0xff] %v2207_v2  ;;  %v2085_v1 = vpop.f32.mrb[66].mxu0  ;;  %v2953_v12 = vpop.eup %2952  ;;  %v3014_v40 = vld [vmem:[%s3623_s28 + $0x388] sm:$0xff] }
 0x1ba   : > { %2664 = vst [vmem:[%s3623_s28 + $0x508] sm:$0xff] %v1688_v25  ;;  %v1566_v45 = vpop.f32.mrb[66].mxu1  ;;  %v2208_v47 = vmul.f32 %v2941_v24, %v2085_v1  ;;  %v2087_v7 = vpop.f32.mrb[67].mxu0  ;;  %v1122_v29 = vadd.f32 1e-08, %v3014_v40  ;;  %2968 = vrcp.f32 %v1121_v33 }
 0x1bb   : > { %v1689_v28 = vmul.f32 %v2941_v24, %v1566_v45  ;;  %v1568_v59 = vpop.f32.mrb[67].mxu1  ;;  %v2209_v58 = vmul.f32 %v2943_v50, %v2087_v7  ;;  %v2955_v53 = vpop.eup %2954  ;;  %v3015_v24 = vld [vmem:[%s3623_s28 + $0x390] sm:$0xff] }
 0x1bc   : > { %v1690_v62 = vmul.f32 %v2943_v50, %v1568_v59  ;;  %2762 = vst [vmem:[%s3623_s28 + $0x710] sm:$0xff] %v2208_v47  ;;  %v2957_v42 = vpop.eup %2956  ;;  %v1123_v45 = vadd.f32 1e-08, %v3015_v24  ;;  %2970 = vrcp.f32 %v1122_v29 }
 0x1bd   : > { %2665 = vst [vmem:[%s3623_s28 + $0x510] sm:$0xff] %v1689_v28  ;;  %2763 = vst [vmem:[%s3623_s28 + $0x718] sm:$0xff] %v2209_v58  ;;  %v2091_v41 = vpop.f32.mrb[68].mxu0  ;;  %v2959_v51 = vpop.eup %2958  ;;  %v3016_v28 = vld [vmem:[%s3623_s28 + $0x398] sm:$0xff] }
 0x1be   : > { %2666 = vst [vmem:[%s3623_s28 + $0x518] sm:$0xff] %v1690_v62  ;;  %v1572_v0 = vpop.f32.mrb[68].mxu1  ;;  %v2210_v35 = vmul.f32 %v2945_v60, %v2091_v41  ;;  %v2093_v6 = vpop.f32.mrb[69].mxu0  ;;  %v1124_v47 = vadd.f32 1e-08, %v3016_v28  ;;  %2972 = vrcp.f32 %v1123_v45 }
 0x1bf   : > { %v1691_v10 = vmul.f32 %v2945_v60, %v1572_v0  ;;  %v1574_v21 = vpop.f32.mrb[69].mxu1  ;;  %v2211_v46 = vmul.f32 %v2947_v13, %v2093_v6  ;;  %v2961_v59 = vpop.eup %2960  ;;  %v3017_v60 = vld [vmem:[%s3623_s28 + $0x3a0] sm:$0xff] }
 0x1c0   : > { %v1692_v32 = vmul.f32 %v2947_v13, %v1574_v21  ;;  %2764 = vst [vmem:[%s3623_s28 + $0x720] sm:$0xff] %v2210_v35  ;;  %v2963_v48 = vpop.eup %2962  ;;  %v1125_v0 = vadd.f32 1e-08, %v3017_v60  ;;  %2974 = vrcp.f32 %v1124_v47 }
 0x1c1   : > { %2667 = vst [vmem:[%s3623_s28 + $0x520] sm:$0xff] %v1691_v10  ;;  %2765 = vst [vmem:[%s3623_s28 + $0x728] sm:$0xff] %v2211_v46  ;;  %v2097_v43 = vpop.f32.mrb[70].mxu0  ;;  %v3018_v10 = vld [vmem:[%s3623_s28 + $0x3a8] sm:$0xff]  ;;  %v2965_v21 = vpop.eup %2964 }
 0x1c2   : > { %2668 = vst [vmem:[%s3623_s28 + $0x528] sm:$0xff] %v1692_v32  ;;  %v1578_v52 = vpop.f32.mrb[70].mxu1  ;;  %v2212_v19 = vmul.f32 %v2949_v49, %v2097_v43  ;;  %v2099_v26 = vpop.f32.mrb[71].mxu0  ;;  %v1126_v35 = vadd.f32 1e-08, %v3018_v10  ;;  %2976 = vrcp.f32 %v1125_v0 }
 0x1c3   : > { %v1693_v63 = vmul.f32 %v2949_v49, %v1578_v52  ;;  %v1580_v15 = vpop.f32.mrb[71].mxu1  ;;  %v2213_v22 = vmul.f32 %v2951_v55, %v2099_v26  ;;  %v2967_v3 = vpop.eup %2966  ;;  %v3019_v49 = vld [vmem:[%s3623_s28 + $0x3b0] sm:$0xff] }
 0x1c4   : > { %v1694_v39 = vmul.f32 %v2951_v55, %v1580_v15  ;;  %2766 = vst [vmem:[%s3623_s28 + $0x730] sm:$0xff] %v2212_v19  ;;  %v1127_v52 = vadd.f32 1e-08, %v3019_v49  ;;  %2978 = vrcp.f32 %v1126_v35  ;;  %v2969_v15 = vpop.eup %2968 }
 0x1c5   : > { %2669 = vst [vmem:[%s3623_s28 + $0x530] sm:$0xff] %v1693_v63  ;;  %2767 = vst [vmem:[%s3623_s28 + $0x738] sm:$0xff] %v2213_v22  ;;  %v2103_v17 = vpop.f32.mrb[72].mxu0  ;;  %v3020_v63 = vld [vmem:[%s3623_s28 + $0x3b8] sm:$0xff] }
 0x1c6   : > { %2670 = vst [vmem:[%s3623_s28 + $0x538] sm:$0xff] %v1694_v39  ;;  %v1584_v36 = vpop.f32.mrb[72].mxu1  ;;  %v2214_v9 = vmul.f32 %v2953_v12, %v2103_v17  ;;  %v2105_v30 = vpop.f32.mrb[73].mxu0  ;;  %v1128_v19 = vadd.f32 1e-08, %v3020_v63  ;;  %2980 = vrcp.f32 %v1127_v52 }
 0x1c7   : > { %v1695_v38 = vmul.f32 %v2953_v12, %v1584_v36  ;;  %v1586_v18 = vpop.f32.mrb[73].mxu1  ;;  %v2215_v37 = vmul.f32 %v2955_v53, %v2105_v30  ;;  %v2971_v16 = vpop.eup %2970  ;;  %v3021_v12 = vld [vmem:[%s3623_s28 + $0x3c0] sm:$0xff] }
 0x1c8   : > { %v1696_v34 = vmul.f32 %v2955_v53, %v1586_v18  ;;  %2768 = vst [vmem:[%s3623_s28 + $0x740] sm:$0xff] %v2214_v9  ;;  %v1129_v36 = vadd.f32 1e-08, %v3021_v12  ;;  %2982 = vrcp.f32 %v1128_v19  ;;  %v2973_v18 = vpop.eup %2972 }
 0x1c9   : > { %2671 = vst [vmem:[%s3623_s28 + $0x540] sm:$0xff] %v1695_v38  ;;  %2769 = vst [vmem:[%s3623_s28 + $0x748] sm:$0xff] %v2215_v37  ;;  %v2109_v27 = vpop.f32.mrb[74].mxu0  ;;  %v3022_v38 = vld [vmem:[%s3623_s28 + $0x3c8] sm:$0xff] }
 0x1ca   : > { %2672 = vst [vmem:[%s3623_s28 + $0x548] sm:$0xff] %v1696_v34  ;;  %v1590_v61 = vpop.f32.mrb[74].mxu1  ;;  %v2216_v2 = vmul.f32 %v2957_v42, %v2109_v27  ;;  %v2111_v23 = vpop.f32.mrb[75].mxu0  ;;  %v1130_v9 = vadd.f32 1e-08, %v3022_v38  ;;  %2984 = vrcp.f32 %v1129_v36 }
 0x1cb   : > { %v1697_v25 = vmul.f32 %v2957_v42, %v1590_v61  ;;  %v1592_v57 = vpop.f32.mrb[75].mxu1  ;;  %v2217_v50 = vmul.f32 %v2959_v51, %v2111_v23  ;;  %v2975_v33 = vpop.eup %2974  ;;  %v3023_v42 = vld [vmem:[%s3623_s28 + $0x3d0] sm:$0xff] }
 0x1cc   : > { %v1698_v1 = vmul.f32 %v2959_v51, %v1592_v57  ;;  %2770 = vst [vmem:[%s3623_s28 + $0x750] sm:$0xff] %v2216_v2  ;;  %v1131_v61 = vadd.f32 1e-08, %v3023_v42  ;;  %2986 = vrcp.f32 %v1130_v9  ;;  %v2977_v57 = vpop.eup %2976 }
 0x1cd   : > { %2673 = vst [vmem:[%s3623_s28 + $0x550] sm:$0xff] %v1697_v25  ;;  %2771 = vst [vmem:[%s3623_s28 + $0x758] sm:$0xff] %v2217_v50  ;;  %v2115_v14 = vpop.f32.mrb[76].mxu0  ;;  %v3024_v25 = vld [vmem:[%s3623_s28 + $0x3d8] sm:$0xff] }
 0x1ce   : > { %2674 = vst [vmem:[%s3623_s28 + $0x558] sm:$0xff] %v1698_v1  ;;  %v1596_v7 = vpop.f32.mrb[76].mxu1  ;;  %v2218_v58 = vmul.f32 %v2961_v59, %v2115_v14  ;;  %v2117_v54 = vpop.f32.mrb[77].mxu0  ;;  %v1132_v2 = vadd.f32 1e-08, %v3024_v25  ;;  %2988 = vrcp.f32 %v1131_v61 }
 0x1cf   : > { %v1699_v62 = vmul.f32 %v2961_v59, %v1596_v7  ;;  %v1598_v11 = vpop.f32.mrb[77].mxu1  ;;  %v2219_v13 = vmul.f32 %v2963_v48, %v2117_v54  ;;  %v2979_v45 = vpop.eup %2978  ;;  %v3025_v59 = vld [vmem:[%s3623_s28 + $0x3e0] sm:$0xff] }
 0x1d0   : > { %v1700_v41 = vmul.f32 %v2963_v48, %v1598_v11  ;;  %2772 = vst [vmem:[%s3623_s28 + $0x760] sm:$0xff] %v2218_v58  ;;  %v1133_v7 = vadd.f32 1e-08, %v3025_v59  ;;  %2990 = vrcp.f32 %v1132_v2  ;;  %v2981_v11 = vpop.eup %2980 }
 0x1d1   : > { %2675 = vst [vmem:[%s3623_s28 + $0x560] sm:$0xff] %v1699_v62  ;;  %2773 = vst [vmem:[%s3623_s28 + $0x768] sm:$0xff] %v2219_v13  ;;  %v2121_v20 = vpop.f32.mrb[78].mxu0  ;;  %v3026_v62 = vld [vmem:[%s3623_s28 + $0x3e8] sm:$0xff] }
 0x1d2   : > { %2676 = vst [vmem:[%s3623_s28 + $0x568] sm:$0xff] %v1700_v41  ;;  %v1602_v6 = vpop.f32.mrb[78].mxu1  ;;  %v2220_v46 = vmul.f32 %v2965_v21, %v2121_v20  ;;  %v2123_v5 = vpop.f32.mrb[79].mxu0  ;;  %v1134_v58 = vadd.f32 1e-08, %v3026_v62  ;;  %2992 = vrcp.f32 %v1133_v7 }
 0x1d3   : > { %v1701_v32 = vmul.f32 %v2965_v21, %v1602_v6  ;;  %v1604_v44 = vpop.f32.mrb[79].mxu1  ;;  %v2221_v55 = vmul.f32 %v2967_v3, %v2123_v5  ;;  %v2983_v0 = vpop.eup %2982  ;;  %v3027_v21 = vld [vmem:[%s3623_s28 + $0x3f0] sm:$0xff] }
 0x1d4   : > { %v1702_v43 = vmul.f32 %v2967_v3, %v1604_v44  ;;  %2774 = vst [vmem:[%s3623_s28 + $0x770] sm:$0xff] %v2220_v46  ;;  %v1135_v6 = vadd.f32 1e-08, %v3027_v21  ;;  %2994 = vrcp.f32 %v1134_v58  ;;  %v2985_v44 = vpop.eup %2984 }
 0x1d5   : > { %2677 = vst [vmem:[%s3623_s28 + $0x570] sm:$0xff] %v1701_v32  ;;  %2775 = vst [vmem:[%s3623_s28 + $0x778] sm:$0xff] %v2221_v55  ;;  %v2127_v31 = vpop.f32.mrb[80].mxu0  ;;  %v3028_v32 = vld [vmem:[%s3623_s28 + $0x3f8] sm:$0xff] }
 0x1d6   : > { %2678 = vst [vmem:[%s3623_s28 + $0x578] sm:$0xff] %v1702_v43  ;;  %v1608_v26 = vpop.f32.mrb[80].mxu1  ;;  %v2222_v22 = vmul.f32 %v2969_v15, %v2127_v31  ;;  %v2129_v8 = vpop.f32.mrb[81].mxu0  ;;  %v1136_v46 = vadd.f32 1e-08, %v3028_v32  ;;  %2996 = vrcp.f32 %v1135_v6 }
 0x1d7   : > { %v1703_v39 = vmul.f32 %v2969_v15, %v1608_v26  ;;  %v1610_v4 = vpop.f32.mrb[81].mxu1  ;;  %v2223_v53 = vmul.f32 %v2971_v16, %v2129_v8  ;;  %v2987_v52 = vpop.eup %2986 }
 0x1d8   : > { %v1704_v17 = vmul.f32 %v2971_v16, %v1610_v4  ;;  %2776 = vst [vmem:[%s3623_s28 + $0x780] sm:$0xff] %v2222_v22  ;;  %2998 = vrcp.f32 %v1136_v46  ;;  %v2989_v31 = vpop.eup %2988 }
 0x1d9   : > { %2679 = vst [vmem:[%s3623_s28 + $0x580] sm:$0xff] %v1703_v39  ;;  %2777 = vst [vmem:[%s3623_s28 + $0x788] sm:$0xff] %v2223_v53  ;;  %v2133_v56 = vpop.f32.mrb[82].mxu0 }
 0x1da   : > { %2680 = vst [vmem:[%s3623_s28 + $0x588] sm:$0xff] %v1704_v17  ;;  %v1614_v30 = vpop.f32.mrb[82].mxu1  ;;  %v2224_v37 = vmul.f32 %v2973_v18, %v2133_v56  ;;  %v2135_v29 = vpop.f32.mrb[83].mxu0 }
 0x1db   : > { %v1705_v34 = vmul.f32 %v2973_v18, %v1614_v30  ;;  %v1616_v40 = vpop.f32.mrb[83].mxu1  ;;  %v2225_v51 = vmul.f32 %v2975_v33, %v2135_v29  ;;  %v2991_v22 = vpop.eup %2990 }
 0x1dc   : > { %v1706_v27 = vmul.f32 %v2975_v33, %v1616_v40  ;;  %2778 = vst [vmem:[%s3623_s28 + $0x790] sm:$0xff] %v2224_v37  ;;  %v2993_v38 = vpop.eup %2992 }
 0x1dd   : > { %2681 = vst [vmem:[%s3623_s28 + $0x590] sm:$0xff] %v1705_v34  ;;  %2779 = vst [vmem:[%s3623_s28 + $0x798] sm:$0xff] %v2225_v51  ;;  %v2139_v24 = vpop.f32.mrb[84].mxu0 }
 0x1de   : > { %2682 = vst [vmem:[%s3623_s28 + $0x598] sm:$0xff] %v1706_v27  ;;  %v1620_v23 = vpop.f32.mrb[84].mxu1  ;;  %v2226_v50 = vmul.f32 %v2977_v57, %v2139_v24  ;;  %v2141_v47 = vpop.f32.mrb[85].mxu0 }
 0x1df   : > { %v1707_v1 = vmul.f32 %v2977_v57, %v1620_v23  ;;  %v1622_v28 = vpop.f32.mrb[85].mxu1  ;;  %v2227_v48 = vmul.f32 %v2979_v45, %v2141_v47  ;;  %v2995_v30 = vpop.eup %2994 }
 0x1e0   : > { %v1708_v14 = vmul.f32 %v2979_v45, %v1622_v28  ;;  %2780 = vst [vmem:[%s3623_s28 + $0x7a0] sm:$0xff] %v2226_v50  ;;  %v2997_v42 = vpop.eup %2996 }
 0x1e1   : > { %2683 = vst [vmem:[%s3623_s28 + $0x5a0] sm:$0xff] %v1707_v1  ;;  %2781 = vst [vmem:[%s3623_s28 + $0x7a8] sm:$0xff] %v2227_v48  ;;  %v2145_v60 = vpop.f32.mrb[86].mxu0 }
 0x1e2   : > { %2684 = vst [vmem:[%s3623_s28 + $0x5a8] sm:$0xff] %v1708_v14  ;;  %v1626_v54 = vpop.f32.mrb[86].mxu1  ;;  %v2228_v13 = vmul.f32 %v2981_v11, %v2145_v60  ;;  %v2147_v35 = vpop.f32.mrb[87].mxu0 }
 0x1e3   : > { %v1709_v41 = vmul.f32 %v2981_v11, %v1626_v54  ;;  %v1628_v10 = vpop.f32.mrb[87].mxu1  ;;  %v2229_v3 = vmul.f32 %v2983_v0, %v2147_v35  ;;  %v2999_v51 = vpop.eup %2998 }
 0x1e4   : > { %v1710_v20 = vmul.f32 %v2983_v0, %v1628_v10  ;;  %2782 = vst [vmem:[%s3623_s28 + $0x7b0] sm:$0xff] %v2228_v13 }
 0x1e5   : > { %2685 = vst [vmem:[%s3623_s28 + $0x5b0] sm:$0xff] %v1709_v41  ;;  %2783 = vst [vmem:[%s3623_s28 + $0x7b8] sm:$0xff] %v2229_v3  ;;  %v2151_v49 = vpop.f32.mrb[88].mxu0 }
 0x1e6   : > { %2686 = vst [vmem:[%s3623_s28 + $0x5b8] sm:$0xff] %v1710_v20  ;;  %v1632_v5 = vpop.f32.mrb[88].mxu1  ;;  %v2230_v55 = vmul.f32 %v2985_v44, %v2151_v49  ;;  %v2153_v19 = vpop.f32.mrb[89].mxu0 }
 0x1e7   : > { %v1711_v43 = vmul.f32 %v2985_v44, %v1632_v5  ;;  %v1634_v63 = vpop.f32.mrb[89].mxu1  ;;  %v2231_v26 = vmul.f32 %v2987_v52, %v2153_v19 }
 0x1e8   : > { %v1712_v15 = vmul.f32 %v2987_v52, %v1634_v63  ;;  %2784 = vst [vmem:[%s3623_s28 + $0x7c0] sm:$0xff] %v2230_v55 }
 0x1e9   : > { %2687 = vst [vmem:[%s3623_s28 + $0x5c0] sm:$0xff] %v1711_v43  ;;  %2785 = vst [vmem:[%s3623_s28 + $0x7c8] sm:$0xff] %v2231_v26  ;;  %v2157_v39 = vpop.f32.mrb[90].mxu0 }
 0x1ea   : > { %2688 = vst [vmem:[%s3623_s28 + $0x5c8] sm:$0xff] %v1712_v15  ;;  %v1638_v16 = vpop.f32.mrb[90].mxu1  ;;  %v2232_v8 = vmul.f32 %v2989_v31, %v2157_v39  ;;  %v2159_v36 = vpop.f32.mrb[91].mxu0 }
 0x1eb   : > { %v1713_v4 = vmul.f32 %v2989_v31, %v1638_v16  ;;  %v1640_v12 = vpop.f32.mrb[91].mxu1  ;;  %v2233_v53 = vmul.f32 %v2991_v22, %v2159_v36 }
 0x1ec   : > { %v1714_v17 = vmul.f32 %v2991_v22, %v1640_v12  ;;  %2786 = vst [vmem:[%s3623_s28 + $0x7d0] sm:$0xff] %v2232_v8 }
 0x1ed   : > { %2689 = vst [vmem:[%s3623_s28 + $0x5d0] sm:$0xff] %v1713_v4  ;;  %2787 = vst [vmem:[%s3623_s28 + $0x7d8] sm:$0xff] %v2233_v53  ;;  %v2163_v18 = vpop.f32.mrb[92].mxu0 }
 0x1ee   : > { %2690 = vst [vmem:[%s3623_s28 + $0x5d8] sm:$0xff] %v1714_v17  ;;  %v1644_v9 = vpop.f32.mrb[92].mxu1  ;;  %v2234_v33 = vmul.f32 %v2993_v38, %v2163_v18  ;;  %v2165_v37 = vpop.f32.mrb[93].mxu0 }
 0x1ef   : > { %v1715_v56 = vmul.f32 %v2993_v38, %v1644_v9  ;;  %v1646_v34 = vpop.f32.mrb[93].mxu1  ;;  %v2235_v29 = vmul.f32 %v2995_v30, %v2165_v37 }
 0x1f0   : > { %v1716_v40 = vmul.f32 %v2995_v30, %v1646_v34  ;;  %2788 = vst [vmem:[%s3623_s28 + $0x7e0] sm:$0xff] %v2234_v33 }
 0x1f1   : > { %2691 = vst [vmem:[%s3623_s28 + $0x5e0] sm:$0xff] %v1715_v56  ;;  %2789 = vst [vmem:[%s3623_s28 + $0x7e8] sm:$0xff] %v2235_v29  ;;  %v2169_v27 = vpop.f32.mrb[94].mxu0 }
 0x1f2   : > { %2692 = vst [vmem:[%s3623_s28 + $0x5e8] sm:$0xff] %v1716_v40  ;;  %v1650_v61 = vpop.f32.mrb[94].mxu1  ;;  %v2236_v2 = vmul.f32 %v2997_v42, %v2169_v27  ;;  %v2171_v23 = vpop.f32.mrb[95].mxu0 }
 0x1f3   : > { %v1717_v25 = vmul.f32 %v2997_v42, %v1650_v61  ;;  %v1652_v57 = vpop.f32.mrb[95].mxu1  ;;  %v2237_v45 = vmul.f32 %v2999_v51, %v2171_v23 }
 0x1f4   : > { %v1718_v24 = vmul.f32 %v2999_v51, %v1652_v57  ;;  %2790 = vst [vmem:[%s3623_s28 + $0x7f0] sm:$0xff] %v2236_v2 }
 0x1f5   : > { %2693 = vst [vmem:[%s3623_s28 + $0x5f0] sm:$0xff] %v1717_v25  ;;  %2791 = vst [vmem:[%s3623_s28 + $0x7f8] sm:$0xff] %v2237_v45 }
 0x1f6   : > { %2694 = vst [vmem:[%s3623_s28 + $0x5f8] sm:$0xff] %v1718_v24 }
 0x1f7   : > { %3102 = shalt.err (!%p3099_p9)
}
 0x1f8   : > { %s3103_s29 = scalar_lea.hbm %s4690_s8, 32768  ;;  %s3107_s5 = scalar_lea.hbm %s4748_s3, 65536 }
 0x1f9   : > { %p3104_p11 = scmp.ne.s32.totalorder %s4690_s8, %s3103_s29  ;;  %p3108_p13 = scmp.lt.u32.totalorder %s4690_s8, %s4748_s3 }
 0x1fa   : > { %p3109_p5 = scmp.lt.u32.totalorder %s3107_s5, %s3103_s29  ;;  %p3111_p0 = scmp.lt.u32.totalorder %s3103_s29, %s4690_s8 }
 0x1fb   : > { %p3105_p3 = pnand %p3104_p11, %p4807_p7 }
 0x1fc   : > { %p3110_p8 = por %p3109_p5, %p3108_p13 }
 0x1fd   : > { %p3106_p6 = pneg %p3105_p3 }
 0x1fe   : > { %p3112_p4 = por %p3111_p0, %p3110_p8 }
 0x200   : > { %p3113_p10 = pnand %p3112_p4, %p3106_p6 }
 0x202   : > { %3116 = shalt.err (!%p3113_p10)
}
 0x203   : > { %s3181_s28 = smov 256   ;;  %s3182_s11 = smov 16  }
 0x204   : > { %2806 = dma.vmem_to_hbm [thread:$0]  (%p4807_p7), %s4692_s19, 32768, %s4690_s8, %s2304_s10, %s3181_s28, %s3181_s28, %s3182_s11  }
 0x205 PF: > { %s2337_s15 = sand.u32 1, %s3155_s12   ;;  %p4808_p12 = scmp.ne.s32.totalorder %s4764_s27, 0 }
 0x206   : > { %p4809_p1 = scmp.ge.s32.totalorder %s3175_s17, 2  ;;  %s2338_s21 = scalar_lea.sflag [#allocation4], %s2337_s15 }
 0x208   : > { %p2816_p2 = pnand %p4809_p1, %p4808_p12 }
 0x20a   : > { %3150 = dma.done.wait (!%p2816_p2), %s2338_s21, 32768  }
 0x20b   : > { %3152 = vsyncadd (!%p2816_p2), %s2338_s21, 4294934528  ;;  %s22_s17 = sadd.s32 1, %s3175_s17   ;;  %s4810_s12 = smov %s3159_s13 }
 0x20c   : > { %p19_p9 = scmp.ge.s32.totalorder %s22_s17, 4   ;;  %s4811_s13 = smov %s3163_s14 }
 0x20d   : > { %s4812_s14 = smov %s3259_s26  ;;  %s4813_s15 = smov %s3171_s16 }
 0x20e   : > { %s4814_s16 = smov %s4816_s20  ;;  %21 = sbr.rel (!%p19_p9) target bundleno = 8 (0x8), region = 96 }
 0x215   :  { %2343 = vsyncpa [#allocation3], 1 }
 0x216   :  { %2345 = vsyncpa [#allocation3 + $0x1], 1 }
 0x217   :  { %2346 = vsyncpa [#allocation6], 1 }
 0x218   :  { %2348 = vsyncpa [#allocation6 + $0x1], 1 }
 0x219   :  { %2349 = vsyncpa [#allocation4], 1 }
 0x21a   :  { %2351 = vsyncpa [#allocation4 + $0x1], 1 }

</bundles_post_ra>
